<compile_context>
chip_gen: v7x
topology: tpu7x:2x2x1
jax: 0.10.0
libtpu: 0.0.40
codegen_flags: <defaults>
</compile_context>

<pallas_src>
import functools

import jax
import jax.numpy as jnp
from jax.experimental import pallas as pl
from jax.experimental.pallas import tpu as pltpu

LANE = 128


def _pad_to(x, axis, mult):
    size = x.shape[axis]
    pad = (-size) % mult
    if pad == 0:
        return x
    widths = [(0, 0)] * x.ndim
    widths[axis] = (0, pad)
    return jnp.pad(x, widths)


# ----------------------------- Pallas kernels --------------------------------
def _feat_xform_kernel(x_ref, w_ref, o_ref):
    """XW1 = attr @ W1 on the (n0, D) BASE attributes only (done once)."""
    o_ref[...] = jnp.dot(
        x_ref[...], w_ref[...], preferred_element_type=jnp.float32
    ).astype(o_ref.dtype)


def _layer1_kernel(a_ref, xw1_ref, b1_ref, w2_ref, o_ref, acc_ref):
    """acc += A_tile @ XW1_tile ; finalize: (ReLU(acc + b1)) @ W2 -> o."""
    k = pl.program_id(1)

    @pl.when(k == 0)
    def _():
        acc_ref[...] = jnp.zeros_like(acc_ref)

    acc_ref[...] += jnp.dot(
        a_ref[...], xw1_ref[...], preferred_element_type=jnp.float32
    )

    @pl.when(k == pl.num_programs(1) - 1)
    def _():
        h1 = jnp.maximum(acc_ref[...] + b1_ref[...], 0.0)  # f32 bias + ReLU
        o_ref[...] = jnp.dot(
            h1.astype(w2_ref.dtype), w2_ref[...], preferred_element_type=jnp.float32
        ).astype(o_ref.dtype)


def _layer2_kernel(a_ref, hw_ref, b2_ref, o_ref, acc_ref):
    """acc += A_tile @ (H1 @ W2)_tile ; finalize: acc + b2 -> o."""
    k = pl.program_id(1)

    @pl.when(k == 0)
    def _():
        acc_ref[...] = jnp.zeros_like(acc_ref)

    acc_ref[...] += jnp.dot(
        a_ref[...], hw_ref[...], preferred_element_type=jnp.float32
    )

    @pl.when(k == pl.num_programs(1) - 1)
    def _():
        o_ref[...] = (acc_ref[...] + b2_ref[...]).astype(o_ref.dtype)


# ----------------------------- pallas_call wrappers ---------------------------
def feature_transform_pallas(attr_bf16, w1_bf16):
    n0, _ = attr_bf16.shape
    hp = w1_bf16.shape[1]
    vmem = pl.BlockSpec(memory_space=pltpu.MemorySpace.VMEM)
    return pl.pallas_call(
        _feat_xform_kernel,
        out_shape=jax.ShapeDtypeStruct((n0, hp), jnp.bfloat16),
        in_specs=[vmem, vmem],
        out_specs=vmem,
    )(attr_bf16, w1_bf16)


def gcn_layer1_pallas(a_hat, xw1_base, b1, w2, *, tm, tk, n0):
    n = a_hat.shape[0]
    hp = xw1_base.shape[1]
    cp = w2.shape[1]
    nb = n0 // tk                      # base XW1 row-blocks; re-read modulo n0
    grid = (n // tm, n // tk)
    flops = 2 * n * n * hp + 2 * n * hp * cp
    bytes_acc = (n * n * 2) + (grid[0] * n0 * hp * 2) + (n * cp * 2) \
        + (hp * 4) + (hp * cp * 2)
    return pl.pallas_call(
        _layer1_kernel,
        out_shape=jax.ShapeDtypeStruct((n, cp), jnp.bfloat16),
        grid_spec=pltpu.PrefetchScalarGridSpec(
            num_scalar_prefetch=0,
            grid=grid,
            in_specs=[
                pl.BlockSpec((tm, tk), lambda i, k: (i, k)),        # A_hat tile (bf16)
                pl.BlockSpec((tk, hp), lambda i, k: (k % nb, 0)),   # base XW1, mod-n0 reuse
                pl.BlockSpec((1, hp), lambda i, k: (0, 0)),         # b1 (f32)
                pl.BlockSpec((hp, cp), lambda i, k: (0, 0)),        # W2 resident (bf16)
            ],
            out_specs=pl.BlockSpec((tm, cp), lambda i, k: (i, 0)),
            scratch_shapes=[pltpu.VMEM((tm, hp), jnp.float32)],
        ),
        compiler_params=pltpu.CompilerParams(
            dimension_semantics=("parallel", "arbitrary"),
            # demo tiles are tiny; raise per-generation (v6e/v5e: bigger tiles
            # + bigger limit, v7x: keep under the 64 MiB physical VMEM).
            vmem_limit_bytes=32 * 1024 * 1024,
        ),
        cost_estimate=pl.CostEstimate(
            flops=flops, transcendentals=0, bytes_accessed=bytes_acc
        ),
    )(a_hat, xw1_base, b1, w2)


def gcn_layer2_pallas(a_hat, h1w2, b2, *, tm, tk):
    n = a_hat.shape[0]
    cp = h1w2.shape[1]
    grid = (n // tm, n // tk)
    flops = 2 * n * n * cp
    bytes_acc = (n * n * 2) + (grid[0] * n * cp * 2) + (n * cp * 4) + (cp * 4)
    return pl.pallas_call(
        _layer2_kernel,
        out_shape=jax.ShapeDtypeStruct((n, cp), jnp.float32),
        grid_spec=pltpu.PrefetchScalarGridSpec(
            num_scalar_prefetch=0,
            grid=grid,
            in_specs=[
                pl.BlockSpec((tm, tk), lambda i, k: (i, k)),   # A_hat tile (bf16)
                pl.BlockSpec((tk, cp), lambda i, k: (k, 0)),   # (H1 @ W2) tile (bf16)
                pl.BlockSpec((1, cp), lambda i, k: (0, 0)),    # b2 (f32)
            ],
            out_specs=pl.BlockSpec((tm, cp), lambda i, k: (i, 0)),
            scratch_shapes=[pltpu.VMEM((tm, cp), jnp.float32)],
        ),
        compiler_params=pltpu.CompilerParams(
            dimension_semantics=("parallel", "arbitrary"),
            vmem_limit_bytes=32 * 1024 * 1024,
        ),
        cost_estimate=pl.CostEstimate(
            flops=flops, transcendentals=0, bytes_accessed=bytes_acc
        ),
    )(a_hat, h1w2, b2)


# --------------------------------- glue (JAX) ---------------------------------
def build_normalized_adjacency(edge_idx, n, dtype=jnp.bfloat16):
    """Dense symmetric GCN-normalized adjacency with self-loops.

    Diagonal is SET to 1.0 (not added), matching add_remaining_self_loops
    semantics for graphs that already contain explicit self-edges.
    """
    # TODO(synk): for smoothing-scale N replace this dense O(N^2) build with a
    # CSR SpMM path (row-pointers via PrefetchScalarGridSpec + in-kernel gather).
    src, dst = edge_idx[0], edge_idx[1]
    a = jnp.zeros((n, n), dtype=jnp.float32)
    a = a.at[src, dst].set(1.0)
    a = a.at[dst, src].set(1.0)                       # symmetrize
    diag = jnp.arange(n)
    a = a.at[diag, diag].set(1.0)                     # remaining self-loops
    deg = jnp.sum(a, axis=1)
    d_inv_sqrt = jax.lax.rsqrt(jnp.maximum(deg, 1e-12))
    a_hat = a * d_inv_sqrt[:, None] * d_inv_sqrt[None, :]
    return a_hat.astype(dtype)


class SparseSmoothingModelPallas:
    """JAX/Pallas port of SparseSmoothingModel(model=2-layer GCN, attr)."""

    def __init__(self, attr, w1, b1, w2, b2, *, tm=128, tk=128):
        self.n0, self.d = attr.shape
        self.hidden = w1.shape[1]
        self.n_classes = w2.shape[1]
        self.tm, self.tk = tm, tk
        # Zero-pad hidden / class dims to 128 lanes; matmul operands in bf16.
        self.attr_bf16 = attr.astype(jnp.bfloat16)
        self.w1_bf16 = _pad_to(w1, 1, LANE).astype(jnp.bfloat16)
        self.b1_f32 = _pad_to(b1, 1, LANE).astype(jnp.float32)
        self.w2_bf16 = _pad_to(_pad_to(w2, 0, LANE), 1, LANE).astype(jnp.bfloat16)
        self.b2_f32 = _pad_to(b2, 1, LANE).astype(jnp.float32)

    @functools.partial(jax.jit, static_argnums=(0, 3, 4))
    def __call__(self, attr_idx, edge_idx, n, d):
        # NOTE: attr_idx is accepted but unused — this matches the reference
        # forward, which only tiles self.attr and ignores attr_idx.
        del attr_idx, d
        n0, tm, tk = self.n0, self.tm, self.tk
        assert n % n0 == 0, "n must be a multiple of attr.shape[0]"
        assert n % tm == 0 and n % tk == 0, "n must divide the A_hat tile sizes"
        assert n0 % tk == 0, "tk must divide the base node count n0"

        # batch_size = n // n0; the tiled X is never materialized: the
        # layer-1 XW1 BlockSpec index_map reads base row-blocks modulo n0.
        xw1_base = feature_transform_pallas(self.attr_bf16, self.w1_bf16)  # (n0, Hp) bf16
        a_hat = build_normalized_adjacency(edge_idx, n)                    # (n, n)  bf16

        h1w2 = gcn_layer1_pallas(
            a_hat, xw1_base, self.b1_f32, self.w2_bf16, tm=tm, tk=tk, n0=n0
        )                                                                  # (n, Cp) bf16
        logits_padded = gcn_layer2_pallas(
            a_hat, h1w2, self.b2_f32, tm=tm, tk=tk
        )                                                                  # (n, Cp) f32
        return logits_padded[:, : self.n_classes]


# ----------------------------------- main -------------------------------------
if __name__ == "__main__":
    key = jax.random.PRNGKey(0)
    k_attr, k_w1, k_w2 = jax.random.split(key, 3)

    # Base graph of n0=256 nodes, d=32 features, batch_size=2 -> N=512.
    n0, d, hidden, n_classes = 256, 32, 32, 8
    batch_size = 2
    n = n0 * batch_size

    attr = jax.random.normal(k_attr, (n0, d), dtype=jnp.float32)

    # Deterministic GCN parameters (synthetic, not a checkpoint load).
    w1 = 0.1 * jax.random.normal(k_w1, (d, hidden), dtype=jnp.float32)
    b1 = jnp.zeros((1, hidden), dtype=jnp.float32)
    w2 = 0.1 * jax.random.normal(k_w2, (hidden, n_classes), dtype=jnp.float32)
    b2 = jnp.zeros((1, n_classes), dtype=jnp.float32)

    # Deterministic batched edge_index: a ring over all n nodes (2, E).
    src = jnp.arange(n, dtype=jnp.int32)
    dst = (src + 1) % n
    edge_idx = jnp.stack([src, dst], axis=0)

    # attr_idx is unused by the reference forward (kept for API parity).
    attr_idx = jnp.zeros((2, 1), dtype=jnp.int32)

    model = SparseSmoothingModelPallas(attr, w1, b1, w2, b2, tm=128, tk=128)
    out = jax.block_until_ready(model(attr_idx, edge_idx, n, d))

    assert out.shape == (n, n_classes) and out.dtype == jnp.float32

    # Pure-JAX reference (bf16-quantized inputs, f32 math) sanity check.
    x = jnp.tile(attr, (batch_size, 1))
    a_f32 = build_normalized_adjacency(edge_idx, n).astype(jnp.float32)
    xb = x.astype(jnp.bfloat16).astype(jnp.float32)
    w1b = w1.astype(jnp.bfloat16).astype(jnp.float32)
    w2b = w2.astype(jnp.bfloat16).astype(jnp.float32)
    h1_ref = jnp.maximum(a_f32 @ (xb @ w1b) + b1, 0.0)
    ref = a_f32 @ (h1_ref @ w2b) + b2
    err = float(jnp.max(jnp.abs(out - ref)))
    assert err < 0.1, f"max abs err vs reference: {err}"

    print("KERNEL_OK")
</pallas_src>

<mosaic_0001>
module attributes {stable_mosaic.version = 11 : i64} {
  func.func @_feat_xform_kernel(%arg0: memref<256x32xbf16, #tpu.memory_space<vmem>>, %arg1: memref<32x128xbf16, #tpu.memory_space<vmem>>, %arg2: memref<256x128xbf16, #tpu.memory_space<vmem>>) attributes {dimension_semantics = [], scalar_prefetch = 0 : i64, scratch_operands = 0 : i64, tpu.core_type = #tpu.core_type<tc>} {
    %c0 = arith.constant 0 : index
    %c0_0 = arith.constant 0 : index
    %0 = vector.load %arg0[%c0, %c0_0] : memref<256x32xbf16, #tpu.memory_space<vmem>>, vector<256x32xbf16>
    %c0_1 = arith.constant 0 : index
    %c0_2 = arith.constant 0 : index
    %1 = vector.load %arg1[%c0_1, %c0_2] : memref<32x128xbf16, #tpu.memory_space<vmem>>, vector<32x128xbf16>
    %cst = arith.constant dense<0.000000e+00> : vector<256x128xf32>
    %2 = tpu.matmul %0, %1, %cst {dimension_numbers = #tpu.dot_dimension_numbers<[1], [0], [0], [1], [0, 0, 1, 1], [], []>} : vector<256x32xbf16>, vector<32x128xbf16>, vector<256x128xf32> -> vector<256x128xf32>
    %3 = arith.truncf %2 : vector<256x128xf32> to vector<256x128xbf16>
    %c0_3 = arith.constant 0 : index
    %c0_4 = arith.constant 0 : index
    %4 = vector.load %arg2[%c0_3, %c0_4] : memref<256x128xbf16, #tpu.memory_space<vmem>>, vector<256x128xbf16>
    tpu.vector_store %arg2[%c0_3, %c0_4], %3 {strides = array<i32>} : memref<256x128xbf16, #tpu.memory_space<vmem>>, vector<256x128xbf16>,
    return
  }
}

module attributes {stable_mosaic.version = 11 : i64} {
  func.func @_layer1_kernel(%arg0: i32, %arg1: i32, %arg2: memref<128x128xbf16, #tpu.memory_space<vmem>>, %arg3: memref<128x128xbf16, #tpu.memory_space<vmem>>, %arg4: memref<1x128xf32, #tpu.memory_space<vmem>>, %arg5: memref<128x128xbf16, #tpu.memory_space<vmem>>, %arg6: memref<128x128xbf16, #tpu.memory_space<vmem>>, %arg7: memref<128x128xf32, #tpu.memory_space<vmem>>) attributes {dimension_semantics = [#tpu.dimension_semantics<parallel>, #tpu.dimension_semantics<arbitrary>], iteration_bounds = array<i64: 4, 4>, scalar_prefetch = 0 : i64, scratch_operands = 1 : i64, tpu.core_type = #tpu.core_type<tc>, window_params = [{transform_indices = @transform_0, window_bounds = array<i64: 128, 128>}, {transform_indices = @transform_1, window_bounds = array<i64: 128, 128>}, {pipeline_mode = #tpu.pipeline_mode<synchronous>, transform_indices = @transform_2, window_bounds = array<i64: 1, 128>}, {pipeline_mode = #tpu.pipeline_mode<synchronous>, transform_indices = @transform_3, window_bounds = array<i64: 128, 128>}, {transform_indices = @transform_4, window_bounds = array<i64: 128, 128>}]} {
    %c0_i32 = arith.constant 0 : i32
    %0 = arith.cmpi eq, %arg1, %c0_i32 : i32
    %1 = arith.extui %0 : i1 to i32
    %c0_i32_0 = arith.constant 0 : i32
    %2 = arith.cmpi ne, %1, %c0_i32_0 : i32
    scf.if %2 {
      %cst_9 = arith.constant 0.000000e+00 : f32
      %12 = vector.broadcast %cst_9 : f32 to vector<128x128xf32>
      %c0_10 = arith.constant 0 : index
      %c0_11 = arith.constant 0 : index
      %13 = vector.load %arg7[%c0_10, %c0_11] : memref<128x128xf32, #tpu.memory_space<vmem>>, vector<128x128xf32>
      tpu.vector_store %arg7[%c0_10, %c0_11], %12 {strides = array<i32>} : memref<128x128xf32, #tpu.memory_space<vmem>>, vector<128x128xf32>,
    } else {
    }
    %c0 = arith.constant 0 : index
    %c0_1 = arith.constant 0 : index
    %3 = vector.load %arg7[%c0, %c0_1] : memref<128x128xf32, #tpu.memory_space<vmem>>, vector<128x128xf32>
    %c0_2 = arith.constant 0 : index
    %c0_3 = arith.constant 0 : index
    %4 = vector.load %arg2[%c0_2, %c0_3] : memref<128x128xbf16, #tpu.memory_space<vmem>>, vector<128x128xbf16>
    %c0_4 = arith.constant 0 : index
    %c0_5 = arith.constant 0 : index
    %5 = vector.load %arg3[%c0_4, %c0_5] : memref<128x128xbf16, #tpu.memory_space<vmem>>, vector<128x128xbf16>
    %cst = arith.constant dense<0.000000e+00> : vector<128x128xf32>
    %6 = tpu.matmul %4, %5, %cst {dimension_numbers = #tpu.dot_dimension_numbers<[1], [0], [0], [1], [0, 0, 1, 1], [], []>} : vector<128x128xbf16>, vector<128x128xbf16>, vector<128x128xf32> -> vector<128x128xf32>
    %7 = arith.addf %3, %6 : vector<128x128xf32>
    %c0_6 = arith.constant 0 : index
    %c0_7 = arith.constant 0 : index
    %8 = vector.load %arg7[%c0_6, %c0_7] : memref<128x128xf32, #tpu.memory_space<vmem>>, vector<128x128xf32>
    tpu.vector_store %arg7[%c0_6, %c0_7], %7 {strides = array<i32>} : memref<128x128xf32, #tpu.memory_space<vmem>>, vector<128x128xf32>,
    %c3_i32 = arith.constant 3 : i32
    %9 = arith.cmpi eq, %arg1, %c3_i32 : i32
    %10 = arith.extui %9 : i1 to i32
    %c0_i32_8 = arith.constant 0 : i32
    %11 = arith.cmpi ne, %10, %c0_i32_8 : i32
    scf.if %11 {
      %c0_9 = arith.constant 0 : index
      %c0_10 = arith.constant 0 : index
      %12 = vector.load %arg7[%c0_9, %c0_10] : memref<128x128xf32, #tpu.memory_space<vmem>>, vector<128x128xf32>
      %c0_11 = arith.constant 0 : index
      %c0_12 = arith.constant 0 : index
      %13 = vector.load %arg4[%c0_11, %c0_12] : memref<1x128xf32, #tpu.memory_space<vmem>>, vector<1x128xf32>
      %14 = vector.broadcast %13 : vector<1x128xf32> to vector<128x128xf32>
      %15 = arith.addf %12, %14 : vector<128x128xf32>
      %cst_13 = arith.constant 0.000000e+00 : f32
      %16 = vector.broadcast %cst_13 : f32 to vector<128x128xf32>
      %17 = arith.maximumf %15, %16 : vector<128x128xf32>
      %18 = arith.truncf %17 : vector<128x128xf32> to vector<128x128xbf16>
      %c0_14 = arith.constant 0 : index
      %c0_15 = arith.constant 0 : index
      %19 = vector.load %arg5[%c0_14, %c0_15] : memref<128x128xbf16, #tpu.memory_space<vmem>>, vector<128x128xbf16>
      %cst_16 = arith.constant dense<0.000000e+00> : vector<128x128xf32>
      %20 = tpu.matmul %18, %19, %cst_16 {dimension_numbers = #tpu.dot_dimension_numbers<[1], [0], [0], [1], [0, 0, 1, 1], [], []>} : vector<128x128xbf16>, vector<128x128xbf16>, vector<128x128xf32> -> vector<128x128xf32>
      %21 = arith.truncf %20 : vector<128x128xf32> to vector<128x128xbf16>
      %c0_17 = arith.constant 0 : index
      %c0_18 = arith.constant 0 : index
      %22 = vector.load %arg6[%c0_17, %c0_18] : memref<128x128xbf16, #tpu.memory_space<vmem>>, vector<128x128xbf16>
      tpu.vector_store %arg6[%c0_17, %c0_18], %21 {strides = array<i32>} : memref<128x128xbf16, #tpu.memory_space<vmem>>, vector<128x128xbf16>,
    } else {
    }
    return
  }
  func.func @transform_0(%arg0: i32, %arg1: i32) -> (i32, i32) {
    %c0_i32 = arith.constant 0 : i32
    return %arg0, %arg1 : i32, i32
  }
  func.func @transform_1(%arg0: i32, %arg1: i32) -> (i32, i32) {
    %c2_i32 = arith.constant 2 : i32
    %c0_i32 = arith.constant 0 : i32
    %0 = arith.cmpi eq, %c2_i32, %c0_i32 : i32
    %c1_i32 = arith.constant 1 : i32
    %1 = arith.select %0, %c1_i32, %c2_i32 : i32
    %2 = arith.remsi %arg1, %1 : i32
    %c0_i32_0 = arith.constant 0 : i32
    %3 = arith.cmpi ne, %2, %c0_i32_0 : i32
    %c0_i32_1 = arith.constant 0 : i32
    %4 = arith.cmpi slt, %2, %c0_i32_1 : i32
    %c0_i32_2 = arith.constant 0 : i32
    %5 = arith.cmpi slt, %1, %c0_i32_2 : i32
    %6 = arith.xori %4, %5 : i1
    %7 = arith.andi %6, %3 : i1
    %8 = arith.addi %2, %1 : i32
    %9 = arith.select %7, %8, %2 : i32
    %c0_i32_3 = arith.constant 0 : i32
    %c0_i32_4 = arith.constant 0 : i32
    return %9, %c0_i32_3 : i32, i32
  }
  func.func @transform_2(%arg0: i32, %arg1: i32) -> (i32, i32) {
    %c0_i32 = arith.constant 0 : i32
    %c0_i32_0 = arith.constant 0 : i32
    %c0_i32_1 = arith.constant 0 : i32
    return %c0_i32, %c0_i32_0 : i32, i32
  }
  func.func @transform_3(%arg0: i32, %arg1: i32) -> (i32, i32) {
    %c0_i32 = arith.constant 0 : i32
    %c0_i32_0 = arith.constant 0 : i32
    %c0_i32_1 = arith.constant 0 : i32
    return %c0_i32, %c0_i32_0 : i32, i32
  }
  func.func @transform_4(%arg0: i32, %arg1: i32) -> (i32, i32) {
    %c0_i32 = arith.constant 0 : i32
    %c0_i32_0 = arith.constant 0 : i32
    return %arg0, %c0_i32 : i32, i32
  }
}

module attributes {stable_mosaic.version = 11 : i64} {
  func.func @_layer2_kernel(%arg0: i32, %arg1: i32, %arg2: memref<128x128xbf16, #tpu.memory_space<vmem>>, %arg3: memref<128x128xbf16, #tpu.memory_space<vmem>>, %arg4: memref<1x128xf32, #tpu.memory_space<vmem>>, %arg5: memref<128x128xf32, #tpu.memory_space<vmem>>, %arg6: memref<128x128xf32, #tpu.memory_space<vmem>>) attributes {dimension_semantics = [#tpu.dimension_semantics<parallel>, #tpu.dimension_semantics<arbitrary>], iteration_bounds = array<i64: 4, 4>, scalar_prefetch = 0 : i64, scratch_operands = 1 : i64, tpu.core_type = #tpu.core_type<tc>, window_params = [{transform_indices = @transform_0, window_bounds = array<i64: 128, 128>}, {transform_indices = @transform_1, window_bounds = array<i64: 128, 128>}, {pipeline_mode = #tpu.pipeline_mode<synchronous>, transform_indices = @transform_2, window_bounds = array<i64: 1, 128>}, {transform_indices = @transform_3, window_bounds = array<i64: 128, 128>}]} {
    %c0_i32 = arith.constant 0 : i32
    %0 = arith.cmpi eq, %arg1, %c0_i32 : i32
    %1 = arith.extui %0 : i1 to i32
    %c0_i32_0 = arith.constant 0 : i32
    %2 = arith.cmpi ne, %1, %c0_i32_0 : i32
    scf.if %2 {
      %cst_9 = arith.constant 0.000000e+00 : f32
      %12 = vector.broadcast %cst_9 : f32 to vector<128x128xf32>
      %c0_10 = arith.constant 0 : index
      %c0_11 = arith.constant 0 : index
      %13 = vector.load %arg6[%c0_10, %c0_11] : memref<128x128xf32, #tpu.memory_space<vmem>>, vector<128x128xf32>
      tpu.vector_store %arg6[%c0_10, %c0_11], %12 {strides = array<i32>} : memref<128x128xf32, #tpu.memory_space<vmem>>, vector<128x128xf32>,
    } else {
    }
    %c0 = arith.constant 0 : index
    %c0_1 = arith.constant 0 : index
    %3 = vector.load %arg6[%c0, %c0_1] : memref<128x128xf32, #tpu.memory_space<vmem>>, vector<128x128xf32>
    %c0_2 = arith.constant 0 : index
    %c0_3 = arith.constant 0 : index
    %4 = vector.load %arg2[%c0_2, %c0_3] : memref<128x128xbf16, #tpu.memory_space<vmem>>, vector<128x128xbf16>
    %c0_4 = arith.constant 0 : index
    %c0_5 = arith.constant 0 : index
    %5 = vector.load %arg3[%c0_4, %c0_5] : memref<128x128xbf16, #tpu.memory_space<vmem>>, vector<128x128xbf16>
    %cst = arith.constant dense<0.000000e+00> : vector<128x128xf32>
    %6 = tpu.matmul %4, %5, %cst {dimension_numbers = #tpu.dot_dimension_numbers<[1], [0], [0], [1], [0, 0, 1, 1], [], []>} : vector<128x128xbf16>, vector<128x128xbf16>, vector<128x128xf32> -> vector<128x128xf32>
    %7 = arith.addf %3, %6 : vector<128x128xf32>
    %c0_6 = arith.constant 0 : index
    %c0_7 = arith.constant 0 : index
    %8 = vector.load %arg6[%c0_6, %c0_7] : memref<128x128xf32, #tpu.memory_space<vmem>>, vector<128x128xf32>
    tpu.vector_store %arg6[%c0_6, %c0_7], %7 {strides = array<i32>} : memref<128x128xf32, #tpu.memory_space<vmem>>, vector<128x128xf32>,
    %c3_i32 = arith.constant 3 : i32
    %9 = arith.cmpi eq, %arg1, %c3_i32 : i32
    %10 = arith.extui %9 : i1 to i32
    %c0_i32_8 = arith.constant 0 : i32
    %11 = arith.cmpi ne, %10, %c0_i32_8 : i32
    scf.if %11 {
      %c0_9 = arith.constant 0 : index
      %c0_10 = arith.constant 0 : index
      %12 = vector.load %arg6[%c0_9, %c0_10] : memref<128x128xf32, #tpu.memory_space<vmem>>, vector<128x128xf32>
      %c0_11 = arith.constant 0 : index
      %c0_12 = arith.constant 0 : index
      %13 = vector.load %arg4[%c0_11, %c0_12] : memref<1x128xf32, #tpu.memory_space<vmem>>, vector<1x128xf32>
      %14 = vector.broadcast %13 : vector<1x128xf32> to vector<128x128xf32>
      %15 = arith.addf %12, %14 : vector<128x128xf32>
      %c0_13 = arith.constant 0 : index
      %c0_14 = arith.constant 0 : index
      %16 = vector.load %arg5[%c0_13, %c0_14] : memref<128x128xf32, #tpu.memory_space<vmem>>, vector<128x128xf32>
      tpu.vector_store %arg5[%c0_13, %c0_14], %15 {strides = array<i32>} : memref<128x128xf32, #tpu.memory_space<vmem>>, vector<128x128xf32>,
    } else {
    }
    return
  }
  func.func @transform_0(%arg0: i32, %arg1: i32) -> (i32, i32) {
    %c0_i32 = arith.constant 0 : i32
    return %arg0, %arg1 : i32, i32
  }
  func.func @transform_1(%arg0: i32, %arg1: i32) -> (i32, i32) {
    %c0_i32 = arith.constant 0 : i32
    %c0_i32_0 = arith.constant 0 : i32
    return %arg1, %c0_i32 : i32, i32
  }
  func.func @transform_2(%arg0: i32, %arg1: i32) -> (i32, i32) {
    %c0_i32 = arith.constant 0 : i32
    %c0_i32_0 = arith.constant 0 : i32
    %c0_i32_1 = arith.constant 0 : i32
    return %c0_i32, %c0_i32_0 : i32, i32
  }
  func.func @transform_3(%arg0: i32, %arg1: i32) -> (i32, i32) {
    %c0_i32 = arith.constant 0 : i32
    %c0_i32_0 = arith.constant 0 : i32
    return %arg0, %c0_i32 : i32, i32
  }
}

</mosaic_0001>

<bundles_post_ra>
// kernel: a_call__.3
= control target key start
LH: loop header
LB: loop body
LE: loop exit
PB: predicated region body
PF: predicated region fallthrough
CT: control target
= control target key end

     0   :  { %vm140_vm0 = vcmask 261120   ;;  %s916_s1 = inlined_call_operand.vmem [shape: bf16[32,128], index: 1, kind: input, shape index: {}]   ;;  %s917_s0 = inlined_call_operand.vmem [shape: bf16[256,32], index: 0, kind: input, shape index: {}]   ;;  %s918_s2 = inlined_call_operand.vmem [shape: bf16[256,128], index: 2, kind: output, shape index: {}]  }
   0x1   :  { %v765_v0 = vld [vmem:[%s916_s1] sm:$0xff]   ;;  %v766_v1 = vld [vmem:[%s916_s1 + $0x8] sm:$0xff]   ;;  %v771_v6 = vld [vmem:[%s917_s0 + $0x10] sm:$0xff]  }
   0x2   :  { %725 = vmatprep.subr.bf16.mxu0 %v765_v0  ;;  %761 = vmatprep.subr.bf16.mxu1 %v765_v0  ;;  %v767_v2 = vld [vmem:[%s917_s0] sm:$0xff]   ;;  %v769_v4 = vld [vmem:[%s917_s0 + $0x8] sm:$0xff]   ;;  %v772_v7 = vld [vmem:[%s917_s0 + $0x50] sm:$0xff]  }
   0x3   :  { %726 = vmatpush3.bf16.msra.mxu0 %v765_v0  ;;  %763 = vmatpush3.bf16.msra.mxu1 %v765_v0  ;;  %v768_v3 = vld [vmem:[%s917_s0 + $0x40] sm:$0xff]   ;;  %v770_v5 = vld [vmem:[%s917_s0 + $0x48] sm:$0xff]   ;;  %v773_v8 = vld [vmem:[%s917_s0 + $0x18] sm:$0xff]  }
   0x4   :  { %727 = vmatprep.subr.bf16.mxu0 %v766_v1  ;;  %762 = vmatprep.subr.bf16.mxu1 %v766_v1  ;;  %v774_v9 = vld [vmem:[%s917_s0 + $0x58] sm:$0xff]   ;;  %v775_v10 = vld [vmem:[%s917_s0 + $0x20] sm:$0xff]   ;;  %v777_v12 = vld [vmem:[%s917_s0 + $0x28] sm:$0xff]  }
   0x5   :  { %729 = vmatprep.mubr.msk.bf16.mxu0 %vm140_vm0, %v767_v2  ;;  %745 = vmatprep.mubr.msk.bf16.mxu1 %vm140_vm0, %v768_v3  ;;  %v776_v11 = vld [vmem:[%s917_s0 + $0x60] sm:$0xff]   ;;  %v778_v13 = vld [vmem:[%s917_s0 + $0x68] sm:$0xff]   ;;  %v779_v14 = vld [vmem:[%s917_s0 + $0x30] sm:$0xff]  }
   0x6   :  { %v780_v15 = vld [vmem:[%s917_s0 + $0x70] sm:$0xff]   ;;  %v781_v16 = vld [vmem:[%s917_s0 + $0x38] sm:$0xff]  }
   0x7   :  { %728 = vmatpush3.bf16.msra.mxu0 %v766_v1  ;;  %764 = vmatpush3.bf16.msra.mxu1 %v766_v1  ;;  %v782_v17 = vld [vmem:[%s917_s0 + $0x78] sm:$0xff]  }
   0xa   :  { %730 = vmatmul.mubr.msk.bf16.vlgmr.msra.gmra.mrb[0].mxu0 %vm140_vm0, %v769_v4  ;;  %746 = vmatmul.mubr.msk.bf16.vlgmr.msra.gmra.mrb[0].mxu1 %vm140_vm0, %v770_v5 }
   0xb   :  { %733 = vmatprep.mubr.msk.bf16.mxu0 %vm140_vm0, %v771_v6  ;;  %749 = vmatprep.mubr.msk.bf16.mxu1 %vm140_vm0, %v772_v7 }
  0x12   :  { %734 = vmatmul.mubr.msk.bf16.gmra.mrb[4].mxu0 %vm140_vm0, %v773_v8  ;;  %750 = vmatmul.mubr.msk.bf16.gmra.mrb[4].mxu1 %vm140_vm0, %v774_v9 }
  0x13   :  { %737 = vmatprep.mubr.msk.bf16.mxu0 %vm140_vm0, %v775_v10  ;;  %753 = vmatprep.mubr.msk.bf16.mxu1 %vm140_vm0, %v776_v11 }
  0x1a   :  { %738 = vmatmul.mubr.msk.bf16.gmra.mrb[8].mxu0 %vm140_vm0, %v777_v12  ;;  %754 = vmatmul.mubr.msk.bf16.gmra.mrb[8].mxu1 %vm140_vm0, %v778_v13 }
  0x1b   :  { %741 = vmatprep.mubr.msk.bf16.mxu0 %vm140_vm0, %v779_v14  ;;  %757 = vmatprep.mubr.msk.bf16.mxu1 %vm140_vm0, %v780_v15 }
  0x22   :  { %742 = vmatmul.mubr.msk.bf16.gmra.mrb[12].mxu0 %vm140_vm0, %v781_v16  ;;  %758 = vmatmul.mubr.msk.bf16.gmra.mrb[12].mxu1 %vm140_vm0, %v782_v17 }
  0xdd   :  { %v731_v18 = vpop.f32.mrb[0].mxu0  ;;  %v747_v19 = vpop.f32.mrb[0].mxu1 }
  0xde   :  { %v223_v20 = vpop.f32.mrb[1].mxu0  ;;  %v287_v21 = vpop.f32.mrb[1].mxu1 }
  0xdf   :  { %v732_v22 = vpop.f32.mrb[2].mxu0  ;;  %v748_v23 = vpop.f32.mrb[2].mxu1 }
  0xe0   :  { %v620_v24 = vpack.c.bf16 %v732_v22, %v731_v18  ;;  %v660_v25 = vpack.c.bf16 %v748_v23, %v747_v19  ;;  %v226_v26 = vpop.f32.mrb[3].mxu0  ;;  %v290_v27 = vpop.f32.mrb[3].mxu1 }
  0xe1   :  { %v615_v28 = vpack.c.bf16 %v226_v26, %v223_v20  ;;  %v655_v29 = vpack.c.bf16 %v290_v27, %v287_v21 }
  0xe2   :  { %692 = vst [vmem:[%s918_s2 + $0x8] sm:$0xff] %v620_v24   ;;  %700 = vst [vmem:[%s918_s2 + $0x48] sm:$0xff] %v660_v25  }
  0xe3   :  { %616 = vst [vmem:[%s918_s2] sm:$0xff] %v615_v28   ;;  %699 = vst [vmem:[%s918_s2 + $0x40] sm:$0xff] %v655_v29  }
  0xe5   :  { %v735_v30 = vpop.f32.mrb[4].mxu0  ;;  %v751_v31 = vpop.f32.mrb[4].mxu1 }
  0xe6   :  { %v239_v32 = vpop.f32.mrb[5].mxu0  ;;  %v303_v33 = vpop.f32.mrb[5].mxu1 }
  0xe7   :  { %v736_v34 = vpop.f32.mrb[6].mxu0  ;;  %v752_v35 = vpop.f32.mrb[6].mxu1 }
  0xe8   :  { %v630_v36 = vpack.c.bf16 %v736_v34, %v735_v30  ;;  %v670_v37 = vpack.c.bf16 %v752_v35, %v751_v31  ;;  %v242_v38 = vpop.f32.mrb[7].mxu0  ;;  %v306_v39 = vpop.f32.mrb[7].mxu1 }
  0xe9   :  { %v625_v40 = vpack.c.bf16 %v242_v38, %v239_v32  ;;  %v665_v41 = vpack.c.bf16 %v306_v39, %v303_v33 }
  0xea   :  { %694 = vst [vmem:[%s918_s2 + $0x18] sm:$0xff] %v630_v36   ;;  %702 = vst [vmem:[%s918_s2 + $0x58] sm:$0xff] %v670_v37  }
  0xeb   :  { %693 = vst [vmem:[%s918_s2 + $0x10] sm:$0xff] %v625_v40   ;;  %701 = vst [vmem:[%s918_s2 + $0x50] sm:$0xff] %v665_v41  }
  0xed   :  { %v739_v42 = vpop.f32.mrb[8].mxu0  ;;  %v755_v43 = vpop.f32.mrb[8].mxu1 }
  0xee   :  { %v255_v44 = vpop.f32.mrb[9].mxu0  ;;  %v319_v45 = vpop.f32.mrb[9].mxu1 }
  0xef   :  { %v740_v46 = vpop.f32.mrb[10].mxu0  ;;  %v756_v47 = vpop.f32.mrb[10].mxu1 }
  0xf0   :  { %v640_v48 = vpack.c.bf16 %v740_v46, %v739_v42  ;;  %v680_v49 = vpack.c.bf16 %v756_v47, %v755_v43  ;;  %v258_v50 = vpop.f32.mrb[11].mxu0  ;;  %v322_v51 = vpop.f32.mrb[11].mxu1 }
  0xf1   :  { %v635_v52 = vpack.c.bf16 %v258_v50, %v255_v44  ;;  %v675_v53 = vpack.c.bf16 %v322_v51, %v319_v45 }
  0xf2   :  { %696 = vst [vmem:[%s918_s2 + $0x28] sm:$0xff] %v640_v48   ;;  %704 = vst [vmem:[%s918_s2 + $0x68] sm:$0xff] %v680_v49  }
  0xf3   :  { %695 = vst [vmem:[%s918_s2 + $0x20] sm:$0xff] %v635_v52   ;;  %703 = vst [vmem:[%s918_s2 + $0x60] sm:$0xff] %v675_v53  }
  0xf5   :  { %v743_v54 = vpop.f32.mrb[12].mxu0  ;;  %v759_v55 = vpop.f32.mrb[12].mxu1 }
  0xf6   :  { %v271_v56 = vpop.f32.mrb[13].mxu0  ;;  %v335_v57 = vpop.f32.mrb[13].mxu1 }
  0xf7   :  { %v744_v58 = vpop.f32.mrb[14].mxu0  ;;  %v760_v59 = vpop.f32.mrb[14].mxu1 }
  0xf8   :  { %v650_v60 = vpack.c.bf16 %v744_v58, %v743_v54  ;;  %v690_v61 = vpack.c.bf16 %v760_v59, %v759_v55  ;;  %v274_v62 = vpop.f32.mrb[15].mxu0  ;;  %v338_v63 = vpop.f32.mrb[15].mxu1 }
  0xf9   :  { %v645_v0 = vpack.c.bf16 %v274_v62, %v271_v56  ;;  %v685_v1 = vpack.c.bf16 %v338_v63, %v335_v57 }
  0xfa   :  { %698 = vst [vmem:[%s918_s2 + $0x38] sm:$0xff] %v650_v60   ;;  %706 = vst [vmem:[%s918_s2 + $0x78] sm:$0xff] %v690_v61  }
  0xfb   :  { %697 = vst [vmem:[%s918_s2 + $0x30] sm:$0xff] %v645_v0   ;;  %705 = vst [vmem:[%s918_s2 + $0x70] sm:$0xff] %v685_v1  }

// kernel: a_call__.5
= control target key start
LH: loop header
LB: loop body
LE: loop exit
PB: predicated region body
PF: predicated region fallthrough
CT: control target
= control target key end

     0   :  { %s1004_s12 = smov 0   ;;  %s1006_s13 = smov 0   ;;  %s1157_s0 = inlined_call_operand.vmem [shape: bf16[512,512], index: 0, kind: input, shape index: {}]   ;;  %s1158_s1 = inlined_call_operand.vmem [shape: bf16[512,128], index: 1, kind: input, shape index: {}]   ;;  %s1159_s2 = inlined_call_operand.vmem [shape: f32[1,128], index: 2, kind: input, shape index: {}]   ;;  %s1160_s3 = inlined_call_operand.vmem [shape: f32[512,128], index: 3, kind: output, shape index: {}]  }
   0x1   :  { %s1008_s14 = smov 0   ;;  %s1010_s15 = smov 0  }
   0x2   :  { %s1012_s16 = smov 0   ;;  %s1014_s17 = smov 0  }
   0x3   :  { %s1016_s18 = smov 0  }
   0x4 LB: > { %s22_s19 = sadd.s32 1, %s973_s16  ;;  %s25_s20 = sadd.s32 1, %s977_s17  ;;  %s981_s18 = sphi %s1016_s18, %s13_s18   ;;  %s977_s17 = sphi %s1014_s17, %s1166_s17   ;;  %s973_s16 = sphi %s1012_s16, %s1165_s16   ;;  %s969_s15 = sphi %s1010_s15, %s1164_s15   ;;  %s965_s14 = sphi %s1008_s14, %s1163_s14   ;;  %s961_s13 = sphi %s1006_s13, %s1162_s13   ;;  %s957_s12 = sphi %s1004_s12, %s1161_s12  }
   0x5   : > { %p23_p0 = scmp.ge.s32.totalorder %s22_s19, 4  ;;  %p41_p1 = scmp.ne.s32.totalorder %s961_s13, %s957_s12 }
   0x6   : > { %p42_p2 = scmp.eq.s32.totalorder %s981_s18, 0  ;;  %s34_s24 = sadd.s32 1, %s961_s13 }
   0x7   : > { %s1168_s19 = smov (%p23_p0, %s22_s19), 0  ;;  %s1170_s20 = smov (!%p23_p0, %s25_s20), %s977_s17 }
   0x8   : > { %p43_p3 = por %p42_p2, %p41_p1  ;;  %p27_p4 = scmp.ge.s32.totalorder %s1170_s20, 4 }
   0x9   : > { %s30_s21 = ssub.s32 %s973_s16, %s1168_s19  ;;  %p757_p6 = scmp.ge.s32.totalorder %s981_s18, 16 }
   0xa   : > { %s1172_s20 = smov (%p27_p4, %s1170_s20), 0 }
   0xb   : > { %s29_s22 = ssub.s32 %s977_s17, %s1172_s20  ;;  %143 = sbr.rel (%p757_p6) target bundleno = 35 (0x23), region = 20 }
   0xc   : > { %s31_s23 = sor.u32 %s30_s21, %s29_s22 }
   0xd   : > { %p32_p5 = scmp.eq.s32.totalorder %s31_s23, 0 }
   0xf   : > { %s1055_s25 = scalar_select %p32_p5, %s961_s13, %s34_s24  }
  0x12   : > { %146 = sbr.rel (!%p43_p3) target bundleno = 35 (0x23), region = 24  ;;  %s148_s26 = sand.u32 (%p43_p3), 1, %s961_s13  }
  0x13   : > { %s789_s27 = sshll.u32 (%p43_p3), %s977_s17, 6  ;;  %s758_s28 = sshll.u32 (%p43_p3), %s148_s26, 6 }
  0x14   : > { %s153_s29 = sadd.s32 (%p43_p3), %s973_s16, %s789_s27  ;;  %s150_s7 = scalar_lea.vmem (%p43_p3), [#allocation3], %s758_s28 }
  0x15   : > { %s761_s30 = sshll.u32 (%p43_p3), %s153_s29, 2 }
  0x16   : > { %s1064_s6 = scalar_lea.vmem (%p43_p3), %s1157_s0, %s761_s30 }
  0x17   : > { %v171_v0 = vld [vmem:[%s1064_s6] sm:$0xf] (%p43_p3)  ;;  %v173_v1 = vld [vmem:[%s1064_s6 + $0x10] sm:$0xf] (%p43_p3) }
  0x18   : > { %v175_v2 = vld [vmem:[%s1064_s6 + $0x20] sm:$0xf] (%p43_p3)  ;;  %172 = vst [vmem:[%s150_s7] sm:$0xf] (%p43_p3), %v171_v0  ;;  %174 = vst [vmem:[%s150_s7 + $0x4] sm:$0xf] (%p43_p3), %v173_v1 }
  0x19   : > { %176 = vst [vmem:[%s150_s7 + $0x8] sm:$0xf] %v175_v2  ;;  %v177_v3 = vld [vmem:[%s1064_s6 + $0x30] sm:$0xf]  ;;  %v179_v4 = vld [vmem:[%s1064_s6 + $0x40] sm:$0xf] }
  0x1a   : > { %v181_v5 = vld [vmem:[%s1064_s6 + $0x50] sm:$0xf]  ;;  %178 = vst [vmem:[%s150_s7 + $0xc] sm:$0xf] %v177_v3  ;;  %180 = vst [vmem:[%s150_s7 + $0x10] sm:$0xf] %v179_v4 }
  0x1b   : > { %182 = vst [vmem:[%s150_s7 + $0x14] sm:$0xf] %v181_v5  ;;  %v183_v6 = vld [vmem:[%s1064_s6 + $0x60] sm:$0xf]  ;;  %v185_v7 = vld [vmem:[%s1064_s6 + $0x70] sm:$0xf] }
  0x1c   : > { %v187_v8 = vld [vmem:[%s1064_s6 + $0x80] sm:$0xf]  ;;  %184 = vst [vmem:[%s150_s7 + $0x18] sm:$0xf] %v183_v6  ;;  %186 = vst [vmem:[%s150_s7 + $0x1c] sm:$0xf] %v185_v7 }
  0x1d   : > { %188 = vst [vmem:[%s150_s7 + $0x20] sm:$0xf] %v187_v8  ;;  %v189_v9 = vld [vmem:[%s1064_s6 + $0x90] sm:$0xf]  ;;  %v191_v10 = vld [vmem:[%s1064_s6 + $0xa0] sm:$0xf] }
  0x1e   : > { %v193_v11 = vld [vmem:[%s1064_s6 + $0xb0] sm:$0xf]  ;;  %190 = vst [vmem:[%s150_s7 + $0x24] sm:$0xf] %v189_v9  ;;  %192 = vst [vmem:[%s150_s7 + $0x28] sm:$0xf] %v191_v10 }
  0x1f   : > { %194 = vst [vmem:[%s150_s7 + $0x2c] sm:$0xf] %v193_v11  ;;  %v195_v12 = vld [vmem:[%s1064_s6 + $0xc0] sm:$0xf]  ;;  %v197_v13 = vld [vmem:[%s1064_s6 + $0xd0] sm:$0xf] }
  0x20   : > { %v199_v14 = vld [vmem:[%s1064_s6 + $0xe0] sm:$0xf]  ;;  %196 = vst [vmem:[%s150_s7 + $0x30] sm:$0xf] %v195_v12  ;;  %198 = vst [vmem:[%s150_s7 + $0x34] sm:$0xf] %v197_v13 }
  0x21   : > { %200 = vst [vmem:[%s150_s7 + $0x38] sm:$0xf] %v199_v14  ;;  %v201_v15 = vld [vmem:[%s1064_s6 + $0xf0] sm:$0xf] }
  0x22   : > { %202 = vst [vmem:[%s150_s7 + $0x3c] sm:$0xf] %v201_v15 }
  0x23 PF: > { %p762_p7 = scmp.ge.s32.totalorder %s981_s18, 1  ;;  %p265_p8 = scmp.lt.s32.totalorder %s981_s18, 17 }
  0x25   : > { %p266_p9 = pnand %p762_p7, %p265_p8 }
  0x26   : > { %s272_s8 = sand.u32 (!%p266_p9), 1, %s957_s12   ;;  %s764_s9 = sshll.u32 (!%p266_p9), %s965_s14, 4 }
  0x27   : > { %269 = sbr.rel (%p266_p9) target bundleno = 326 (0x146), region = 69  ;;  %s763_s10 = sshll.u32 (!%p266_p9), %s272_s8, 6 }
  0x28   : > { %p302_p10 = scmp.lt.s32.totalorder (!%p266_p9), %s764_s9, 63  ;;  %s766_s11 = sshll.u32 (!%p266_p9), %s969_s15, 4 }
  0x29   : > { %p308_p11 = scmp.lt.s32.totalorder (!%p266_p9), %s766_s11, 63  ;;  %s1097_s12 = scalar_lea.vmem (!%p266_p9), [#allocation3], %s763_s10 }
  0x2a   : > { %p768_p12 = scmp.ne.s32.totalorder (!%p266_p9), %s965_s14, 0 }
  0x2e   : > { %s1174_s9 = smov (!%p302_p10, %s764_s9), 63  ;;  %s1176_s11 = smov (!%p308_p11, %s766_s11), 63 }
  0x2f   : > { %s765_s21 = sshll.u32 %s1174_s9, 2  ;;  %s767_s26 = sshll.u32 %s1176_s11, 3  ;;  %v983_v16 = vmov (!%p768_p12), 0.0  }
  0x30   : > { %s1090_s24 = scalar_lea.vmem %s1158_s1, %s765_s21  ;;  %s1095_s29 = scalar_lea.vmem %s1160_s3, %s767_s26  ;;  %318 = vst [vmem:[#allocation2] sm:$0xff] (!%p768_p12), %v983_v16  ;;  %319 = vst [vmem:[#allocation2 + $0x8] sm:$0xff] (!%p768_p12), %v983_v16 }
  0x31   : > { %317 = sbr.rel (%p768_p12) target bundleno = 56 (0x38), region = 77  ;;  %320 = vst [vmem:[#allocation2 + $0x10] sm:$0xff] (!%p768_p12), %v983_v16  ;;  %321 = vst [vmem:[#allocation2 + $0x18] sm:$0xff] (!%p768_p12), %v983_v16 }
  0x32   : > { %322 = vst [vmem:[#allocation2 + $0x20] sm:$0xff] (!%p768_p12), %v983_v16  ;;  %323 = vst [vmem:[#allocation2 + $0x28] sm:$0xff] (!%p768_p12), %v983_v16 }
  0x33   : > { %324 = vst [vmem:[#allocation2 + $0x30] sm:$0xff] (!%p768_p12), %v983_v16  ;;  %325 = vst [vmem:[#allocation2 + $0x38] sm:$0xff] (!%p768_p12), %v983_v16 }
  0x34   : > { %326 = vst [vmem:[#allocation2 + $0x40] sm:$0xff] (!%p768_p12), %v983_v16  ;;  %327 = vst [vmem:[#allocation2 + $0x48] sm:$0xff] (!%p768_p12), %v983_v16 }
  0x35   : > { %328 = vst [vmem:[#allocation2 + $0x50] sm:$0xff] (!%p768_p12), %v983_v16  ;;  %329 = vst [vmem:[#allocation2 + $0x58] sm:$0xff] (!%p768_p12), %v983_v16 }
  0x36   : > { %330 = vst [vmem:[#allocation2 + $0x60] sm:$0xff] (!%p768_p12), %v983_v16  ;;  %331 = vst [vmem:[#allocation2 + $0x68] sm:$0xff] (!%p768_p12), %v983_v16 }
  0x37   : > { %332 = vst [vmem:[#allocation2 + $0x70] sm:$0xff] (!%p768_p12), %v983_v16  ;;  %333 = vst [vmem:[#allocation2 + $0x78] sm:$0xff] (!%p768_p12), %v983_v16 }
  0x38 PF: > { %v911_v17 = vld [vmem:[%s1090_s24] sm:$0xff]   ;;  %v912_v18 = vld [vmem:[%s1090_s24 + $0x8] sm:$0xff]   ;;  %v913_v19 = vld [vmem:[%s1090_s24 + $0x10] sm:$0xff]   ;;  %p785_p13 = scmp.ne.s32.totalorder %s965_s14, 3 }
  0x39   : > { %806 = vmatprep.subr.bf16.mxu0 %v911_v17  ;;  %838 = vmatprep.subr.bf16.mxu1 %v911_v17  ;;  %v914_v20 = vld [vmem:[%s1090_s24 + $0x18] sm:$0xff]   ;;  %v919_v21 = vld [vmem:[%s1097_s12] sm:$0xff]   ;;  %v916_v24 = vld [vmem:[%s1090_s24 + $0x28] sm:$0xff]  }
  0x3a   : > { %807 = vmatpush3.bf16.msra.mxu0 %v911_v17  ;;  %846 = vmatpush3.bf16.msra.mxu1 %v911_v17  ;;  %v920_v22 = vld [vmem:[%s1097_s12 + $0x20] sm:$0xff]   ;;  %v917_v25 = vld [vmem:[%s1090_s24 + $0x30] sm:$0xff]   ;;  %v918_v26 = vld [vmem:[%s1090_s24 + $0x38] sm:$0xff]  }
  0x3b   : > { %808 = vmatprep.subr.bf16.mxu0 %v912_v18  ;;  %839 = vmatprep.subr.bf16.mxu1 %v912_v18  ;;  %v915_v23 = vld [vmem:[%s1090_s24 + $0x20] sm:$0xff]   ;;  %v921_v27 = vld [vmem:[%s1097_s12 + $0x8] sm:$0xff]   ;;  %v923_v29 = vld [vmem:[%s1097_s12 + $0x10] sm:$0xff]  }
  0x3c   : > { %822 = vmatprep.mubr.bf16.mxu0 %v919_v21  ;;  %830 = vmatprep.mubr.bf16.mxu1 %v920_v22  ;;  %v922_v28 = vld [vmem:[%s1097_s12 + $0x28] sm:$0xff]   ;;  %v924_v30 = vld [vmem:[%s1097_s12 + $0x30] sm:$0xff]   ;;  %v925_v31 = vld [vmem:[%s1097_s12 + $0x18] sm:$0xff]  }
  0x3d   : > { %v926_v32 = vld [vmem:[%s1097_s12 + $0x38] sm:$0xff]   ;;  %v336_v33 = vld [vmem:[#allocation2 + $0x10] sm:$0xff]  ;;  %v334_v35 = vld [vmem:[#allocation2] sm:$0xff] }
  0x3e   : > { %809 = vmatpush3.bf16.msra.mxu0 %v912_v18  ;;  %847 = vmatpush3.bf16.msra.mxu1 %v912_v18  ;;  %v344_v34 = vld [vmem:[#allocation2 + $0x50] sm:$0xff]  ;;  %v342_v36 = vld [vmem:[#allocation2 + $0x40] sm:$0xff]  ;;  %v337_v39 = vld [vmem:[#allocation2 + $0x18] sm:$0xff] }
  0x3f   : > { %810 = vmatprep.subr.bf16.mxu0 %v913_v19  ;;  %840 = vmatprep.subr.bf16.mxu1 %v913_v19  ;;  %v345_v40 = vld [vmem:[#allocation2 + $0x58] sm:$0xff]  ;;  %v335_v45 = vld [vmem:[#allocation2 + $0x8] sm:$0xff]  ;;  %v340_v57 = vld [vmem:[#allocation2 + $0x30] sm:$0xff] }
  0x40   : > { %v343_v46 = vld [vmem:[#allocation2 + $0x48] sm:$0xff]  ;;  %v348_v58 = vld [vmem:[#allocation2 + $0x70] sm:$0xff]  ;;  %v338_v59 = vld [vmem:[#allocation2 + $0x20] sm:$0xff] }
  0x41   : > { %v346_v60 = vld [vmem:[#allocation2 + $0x60] sm:$0xff]  ;;  %v341_v63 = vld [vmem:[#allocation2 + $0x38] sm:$0xff]  ;;  %v339_v5 = vld [vmem:[#allocation2 + $0x28] sm:$0xff] }
  0x42   : > { %811 = vmatpush3.bf16.msra.mxu0 %v913_v19  ;;  %848 = vmatpush3.bf16.msra.mxu1 %v913_v19  ;;  %v349_v0 = vld [vmem:[#allocation2 + $0x78] sm:$0xff]  ;;  %v347_v6 = vld [vmem:[#allocation2 + $0x68] sm:$0xff]  ;;  %v786_v18 = vld [vmem:[%s1159_s2] ss:$0 sm:$0xff] (!%p785_p13) }
  0x43   : > { %812 = vmatprep.subr.bf16.mxu0 %v914_v20  ;;  %841 = vmatprep.subr.bf16.mxu1 %v914_v20 }
  0x46   : > { %813 = vmatpush3.bf16.msra.mxu0 %v914_v20  ;;  %849 = vmatpush3.bf16.msra.mxu1 %v914_v20 }
  0x47   : > { %814 = vmatprep.subr.bf16.mxu0 %v915_v23  ;;  %842 = vmatprep.subr.bf16.mxu1 %v915_v23 }
  0x4a   : > { %815 = vmatpush3.bf16.msra.mxu0 %v915_v23  ;;  %850 = vmatpush3.bf16.msra.mxu1 %v915_v23 }
  0x4b   : > { %816 = vmatprep.subr.bf16.mxu0 %v916_v24  ;;  %843 = vmatprep.subr.bf16.mxu1 %v916_v24 }
  0x4e   : > { %817 = vmatpush3.bf16.msra.mxu0 %v916_v24  ;;  %851 = vmatpush3.bf16.msra.mxu1 %v916_v24 }
  0x4f   : > { %818 = vmatprep.subr.bf16.mxu0 %v917_v25  ;;  %844 = vmatprep.subr.bf16.mxu1 %v917_v25 }
  0x52   : > { %819 = vmatpush3.bf16.msra.mxu0 %v917_v25  ;;  %852 = vmatpush3.bf16.msra.mxu1 %v917_v25 }
  0x53   : > { %820 = vmatprep.subr.bf16.mxu0 %v918_v26  ;;  %845 = vmatprep.subr.bf16.mxu1 %v918_v26 }
  0x56   : > { %821 = vmatpush3.bf16.msra.mxu0 %v918_v26  ;;  %853 = vmatpush3.bf16.msra.mxu1 %v918_v26 }
  0x59   : > { %823 = vmatmul.mubr.bf16.vlgmr.msra.gmra.mrb[0].mxu0 %v921_v27  ;;  %831 = vmatmul.mubr.bf16.vlgmr.msra.gmra.mrb[0].mxu1 %v922_v28 }
  0x5a   : > { %826 = vmatprep.mubr.bf16.mxu0 %v923_v29  ;;  %834 = vmatprep.mubr.bf16.mxu1 %v924_v30 }
  0x61   : > { %827 = vmatmul.mubr.bf16.gmra.mrb[4].mxu0 %v925_v31  ;;  %835 = vmatmul.mubr.bf16.gmra.mrb[4].mxu1 %v926_v32 }
 0x12c   : > { %v824_v37 = vpop.f32.mrb[0].mxu0  ;;  %v832_v38 = vpop.f32.mrb[0].mxu1 }
 0x12d   : > { %v577_v41 = vadd.f32 %v824_v37, %v336_v33  ;;  %v585_v42 = vadd.f32 %v832_v38, %v344_v34  ;;  %v512_v43 = vpop.f32.mrb[1].mxu0  ;;  %v544_v44 = vpop.f32.mrb[1].mxu1 }
 0x12e   : > { %v575_v47 = vadd.f32 %v512_v43, %v334_v35  ;;  %v583_v48 = vadd.f32 %v544_v44, %v342_v36  ;;  %v825_v49 = vpop.f32.mrb[2].mxu0  ;;  %v833_v50 = vpop.f32.mrb[2].mxu1 }
 0x12f   : > { %593 = vst [vmem:[#allocation2 + $0x10] sm:$0xff] %v577_v41  ;;  %601 = vst [vmem:[#allocation2 + $0x50] sm:$0xff] %v585_v42  ;;  %v578_v51 = vadd.f32 %v825_v49, %v337_v39  ;;  %v586_v52 = vadd.f32 %v833_v50, %v345_v40  ;;  %v515_v53 = vpop.f32.mrb[3].mxu0  ;;  %v547_v54 = vpop.f32.mrb[3].mxu1 }
 0x130   : > { %591 = vst [vmem:[#allocation2] sm:$0xff] %v575_v47  ;;  %599 = vst [vmem:[#allocation2 + $0x40] sm:$0xff] %v583_v48  ;;  %v576_v55 = vadd.f32 %v515_v53, %v335_v45  ;;  %v584_v56 = vadd.f32 %v547_v54, %v343_v46 }
 0x131   : > { %594 = vst [vmem:[#allocation2 + $0x18] sm:$0xff] %v578_v51  ;;  %602 = vst [vmem:[#allocation2 + $0x58] sm:$0xff] %v586_v52 }
 0x132   : > { %592 = vst [vmem:[#allocation2 + $0x8] sm:$0xff] %v576_v55  ;;  %600 = vst [vmem:[#allocation2 + $0x48] sm:$0xff] %v584_v56 }
 0x134   : > { %v828_v61 = vpop.f32.mrb[4].mxu0  ;;  %v836_v62 = vpop.f32.mrb[4].mxu1  ;;  %610 = sbr.rel (%p785_p13) target bundleno = 326 (0x146), region = 81 }
 0x135   : > { %v581_v1 = vadd.f32 %v828_v61, %v340_v57  ;;  %v589_v2 = vadd.f32 %v836_v62, %v348_v58  ;;  %v528_v3 = vpop.f32.mrb[5].mxu0  ;;  %v560_v4 = vpop.f32.mrb[5].mxu1 }
 0x136   : > { %v579_v7 = vadd.f32 %v528_v3, %v338_v59  ;;  %v587_v8 = vadd.f32 %v560_v4, %v346_v60  ;;  %v829_v9 = vpop.f32.mrb[6].mxu0  ;;  %v837_v10 = vpop.f32.mrb[6].mxu1  ;;  %v613_v22 = vld [vmem:[#allocation2 + $0x10] sm:$0xff] (!%p785_p13) }
 0x137   : > { %597 = vst [vmem:[#allocation2 + $0x30] sm:$0xff] %v581_v1  ;;  %605 = vst [vmem:[#allocation2 + $0x70] sm:$0xff] %v589_v2  ;;  %v582_v11 = vadd.f32 %v829_v9, %v341_v63  ;;  %v590_v12 = vadd.f32 %v837_v10, %v349_v0  ;;  %v531_v13 = vpop.f32.mrb[7].mxu0  ;;  %v563_v14 = vpop.f32.mrb[7].mxu1  ;;  %v611_v17 = vld [vmem:[#allocation2] sm:$0xff] (!%p785_p13)  ;;  %v636_v25 = vadd.f32 (!%p785_p13), %v786_v18, %v613_v22  ;;  %v621_v36 = vld [vmem:[#allocation2 + $0x50] sm:$0xff] (!%p785_p13) }
 0x138   : > { %595 = vst [vmem:[#allocation2 + $0x20] sm:$0xff] %v579_v7  ;;  %603 = vst [vmem:[#allocation2 + $0x60] sm:$0xff] %v587_v8  ;;  %v580_v15 = vadd.f32 %v531_v13, %v339_v5  ;;  %v588_v16 = vadd.f32 %v563_v14, %v347_v6  ;;  %v634_v20 = vadd.f32 (!%p785_p13), %v786_v18, %v611_v17  ;;  %v614_v23 = vld [vmem:[#allocation2 + $0x18] sm:$0xff] (!%p785_p13)  ;;  %v619_v34 = vld [vmem:[#allocation2 + $0x40] sm:$0xff] (!%p785_p13) }
 0x139   : > { %598 = vst [vmem:[#allocation2 + $0x38] sm:$0xff] %v582_v11  ;;  %606 = vst [vmem:[#allocation2 + $0x78] sm:$0xff] %v590_v12  ;;  %v612_v19 = vld [vmem:[#allocation2 + $0x8] sm:$0xff] (!%p785_p13)  ;;  %v637_v26 = vadd.f32 (!%p785_p13), %v786_v18, %v614_v23  ;;  %v642_v37 = vadd.f32 (!%p785_p13), %v786_v18, %v619_v34  ;;  %v644_v39 = vadd.f32 (!%p785_p13), %v786_v18, %v621_v36  ;;  %v622_v40 = vld [vmem:[#allocation2 + $0x58] sm:$0xff] (!%p785_p13) }
 0x13a   : > { %596 = vst [vmem:[#allocation2 + $0x28] sm:$0xff] %v580_v15  ;;  %604 = vst [vmem:[#allocation2 + $0x68] sm:$0xff] %v588_v16  ;;  %v635_v21 = vadd.f32 (!%p785_p13), %v786_v18, %v612_v19  ;;  %v620_v35 = vld [vmem:[#allocation2 + $0x48] sm:$0xff] (!%p785_p13)  ;;  %v645_v43 = vadd.f32 (!%p785_p13), %v786_v18, %v622_v40 }
 0x13b   : > { %650 = vst [vmem:[%s1095_s29] sm:$0xff] %v634_v20  ;;  %652 = vst [vmem:[%s1095_s29 + $0x10] sm:$0xff] %v636_v25  ;;  %v643_v38 = vadd.f32 %v786_v18, %v620_v35 }
 0x13c   : > { %651 = vst [vmem:[%s1095_s29 + $0x8] sm:$0xff] %v635_v21  ;;  %653 = vst [vmem:[%s1095_s29 + $0x18] sm:$0xff] %v637_v26 }
 0x13d   : > { %658 = vst [vmem:[%s1095_s29 + $0x40] sm:$0xff] %v642_v37  ;;  %659 = vst [vmem:[%s1095_s29 + $0x48] sm:$0xff] %v643_v38 }
 0x13e   : > { %v617_v29 = vld [vmem:[#allocation2 + $0x30] sm:$0xff]  ;;  %660 = vst [vmem:[%s1095_s29 + $0x50] sm:$0xff] %v644_v39  ;;  %661 = vst [vmem:[%s1095_s29 + $0x58] sm:$0xff] %v645_v43 }
 0x13f   : > { %v615_v24 = vld [vmem:[#allocation2 + $0x20] sm:$0xff]  ;;  %v640_v32 = vadd.f32 %v786_v18, %v617_v29  ;;  %v625_v46 = vld [vmem:[#allocation2 + $0x70] sm:$0xff] }
 0x140   : > { %v638_v27 = vadd.f32 %v786_v18, %v615_v24  ;;  %v618_v30 = vld [vmem:[#allocation2 + $0x38] sm:$0xff]  ;;  %v623_v41 = vld [vmem:[#allocation2 + $0x60] sm:$0xff]  ;;  %v648_v48 = vadd.f32 %v786_v18, %v625_v46 }
 0x141   : > { %v616_v28 = vld [vmem:[#allocation2 + $0x28] sm:$0xff]  ;;  %v641_v33 = vadd.f32 %v786_v18, %v618_v30  ;;  %656 = vst [vmem:[%s1095_s29 + $0x30] sm:$0xff] %v640_v32  ;;  %v646_v44 = vadd.f32 %v786_v18, %v623_v41  ;;  %v626_v47 = vld [vmem:[#allocation2 + $0x78] sm:$0xff] }
 0x142   : > { %v639_v31 = vadd.f32 %v786_v18, %v616_v28  ;;  %654 = vst [vmem:[%s1095_s29 + $0x20] sm:$0xff] %v638_v27  ;;  %v624_v42 = vld [vmem:[#allocation2 + $0x68] sm:$0xff]  ;;  %v649_v49 = vadd.f32 %v786_v18, %v626_v47  ;;  %664 = vst [vmem:[%s1095_s29 + $0x70] sm:$0xff] %v648_v48 }
 0x143   : > { %657 = vst [vmem:[%s1095_s29 + $0x38] sm:$0xff] %v641_v33  ;;  %v647_v45 = vadd.f32 %v786_v18, %v624_v42  ;;  %662 = vst [vmem:[%s1095_s29 + $0x60] sm:$0xff] %v646_v44 }
 0x144   : > { %655 = vst [vmem:[%s1095_s29 + $0x28] sm:$0xff] %v639_v31  ;;  %665 = vst [vmem:[%s1095_s29 + $0x78] sm:$0xff] %v649_v49 }
 0x145   : > { %663 = vst [vmem:[%s1095_s29 + $0x68] sm:$0xff] %v647_v45 }
 0x146 PF: > { %s13_s18 = sadd.s32 1, %s981_s18   ;;  %s1161_s12 = smov %s961_s13 }
 0x147   : > { %p10_p0 = scmp.ge.s32.totalorder %s13_s18, 18   ;;  %s1162_s13 = smov %s1055_s25 }
 0x148   : > { %s1163_s14 = smov %s973_s16  ;;  %s1164_s15 = smov %s977_s17 }
 0x149   : > { %s1165_s16 = smov %s1168_s19  ;;  %s1166_s17 = smov %s1172_s20 }
 0x14a   :  { %12 = sbr.rel (!%p10_p0) target bundleno = 4 (0x4), region = 119 }

// kernel: a_call__.4
= control target key start
LH: loop header
LB: loop body
LE: loop exit
PB: predicated region body
PF: predicated region fallthrough
CT: control target
= control target key end

     0   :  { %s1537_s15 = smov 0   ;;  %s1539_s16 = smov 0   ;;  %s1726_s0 = inlined_call_operand.vmem [shape: bf16[512,512], index: 0, kind: input, shape index: {}]   ;;  %s1727_s1 = inlined_call_operand.vmem [shape: bf16[256,128], index: 1, kind: input, shape index: {}]   ;;  %s1728_s2 = inlined_call_operand.vmem [shape: f32[1,128], index: 2, kind: input, shape index: {}]   ;;  %s1729_s3 = inlined_call_operand.vmem [shape: bf16[128,128], index: 3, kind: input, shape index: {}]   ;;  %s1730_s4 = inlined_call_operand.vmem [shape: bf16[512,128], index: 4, kind: output, shape index: {}]  }
   0x1   :  { %s1541_s17 = smov 0   ;;  %s1543_s18 = smov 0  }
   0x2   :  { %s1545_s19 = smov 0   ;;  %s1547_s20 = smov 0  }
   0x3   :  { %s1549_s21 = smov 0  }
   0x4 LB: > { %s23_s22 = sadd.s32 1, %s1501_s19  ;;  %s26_s23 = sadd.s32 1, %s1505_s20  ;;  %s1509_s21 = sphi %s1549_s21, %s14_s21   ;;  %s1505_s20 = sphi %s1547_s20, %s1736_s20   ;;  %s1501_s19 = sphi %s1545_s19, %s1735_s19   ;;  %s1497_s18 = sphi %s1543_s18, %s1734_s18   ;;  %s1493_s17 = sphi %s1541_s17, %s1733_s17   ;;  %s1489_s16 = sphi %s1539_s16, %s1732_s16   ;;  %s1485_s15 = sphi %s1537_s15, %s1731_s15  }
   0x5   : > { %p24_p0 = scmp.ge.s32.totalorder %s23_s22, 4  ;;  %p42_p1 = scmp.ne.s32.totalorder %s1489_s16, %s1485_s15 }
   0x6   : > { %p43_p2 = scmp.eq.s32.totalorder %s1509_s21, 0  ;;  %s35_s27 = sadd.s32 1, %s1489_s16 }
   0x7   : > { %s1738_s22 = smov (%p24_p0, %s23_s22), 0  ;;  %s1740_s23 = smov (!%p24_p0, %s26_s23), %s1505_s20 }
   0x8   : > { %p44_p3 = por %p43_p2, %p42_p1  ;;  %p28_p4 = scmp.ge.s32.totalorder %s1740_s23, 4 }
   0x9   : > { %s31_s24 = ssub.s32 %s1501_s19, %s1738_s22  ;;  %p1123_p6 = scmp.ge.s32.totalorder %s1509_s21, 16 }
   0xa   : > { %s1742_s23 = smov (%p28_p4, %s1740_s23), 0 }
   0xb   : > { %s30_s25 = ssub.s32 %s1505_s20, %s1742_s23  ;;  %192 = sbr.rel (%p1123_p6) target bundleno = 35 (0x23), region = 24 }
   0xc   : > { %s32_s26 = sor.u32 %s31_s24, %s30_s25 }
   0xd   : > { %p33_p5 = scmp.eq.s32.totalorder %s32_s26, 0 }
   0xf   : > { %s1588_s28 = scalar_select %p33_p5, %s1489_s16, %s35_s27  }
  0x12   : > { %195 = sbr.rel (!%p44_p3) target bundleno = 35 (0x23), region = 28  ;;  %s197_s29 = sand.u32 (%p44_p3), 1, %s1489_s16  }
  0x13   : > { %s1182_s30 = sshll.u32 (%p44_p3), %s1505_s20, 6  ;;  %s1124_s5 = sshll.u32 (%p44_p3), %s197_s29, 6 }
  0x14   : > { %s202_s6 = sadd.s32 (%p44_p3), %s1501_s19, %s1182_s30  ;;  %s199_s11 = scalar_lea.vmem (%p44_p3), [#allocation3], %s1124_s5 }
  0x15   : > { %s1127_s7 = sshll.u32 (%p44_p3), %s202_s6, 2 }
  0x16   : > { %s1597_s10 = scalar_lea.vmem (%p44_p3), %s1726_s0, %s1127_s7 }
  0x17   : > { %v220_v0 = vld [vmem:[%s1597_s10] sm:$0xf] (%p44_p3)  ;;  %v222_v1 = vld [vmem:[%s1597_s10 + $0x10] sm:$0xf] (%p44_p3) }
  0x18   : > { %v224_v2 = vld [vmem:[%s1597_s10 + $0x20] sm:$0xf] (%p44_p3)  ;;  %221 = vst [vmem:[%s199_s11] sm:$0xf] (%p44_p3), %v220_v0  ;;  %223 = vst [vmem:[%s199_s11 + $0x4] sm:$0xf] (%p44_p3), %v222_v1 }
  0x19   : > { %225 = vst [vmem:[%s199_s11 + $0x8] sm:$0xf] %v224_v2  ;;  %v226_v3 = vld [vmem:[%s1597_s10 + $0x30] sm:$0xf]  ;;  %v228_v4 = vld [vmem:[%s1597_s10 + $0x40] sm:$0xf] }
  0x1a   : > { %v230_v5 = vld [vmem:[%s1597_s10 + $0x50] sm:$0xf]  ;;  %227 = vst [vmem:[%s199_s11 + $0xc] sm:$0xf] %v226_v3  ;;  %229 = vst [vmem:[%s199_s11 + $0x10] sm:$0xf] %v228_v4 }
  0x1b   : > { %231 = vst [vmem:[%s199_s11 + $0x14] sm:$0xf] %v230_v5  ;;  %v232_v6 = vld [vmem:[%s1597_s10 + $0x60] sm:$0xf]  ;;  %v234_v7 = vld [vmem:[%s1597_s10 + $0x70] sm:$0xf] }
  0x1c   : > { %v236_v8 = vld [vmem:[%s1597_s10 + $0x80] sm:$0xf]  ;;  %233 = vst [vmem:[%s199_s11 + $0x18] sm:$0xf] %v232_v6  ;;  %235 = vst [vmem:[%s199_s11 + $0x1c] sm:$0xf] %v234_v7 }
  0x1d   : > { %237 = vst [vmem:[%s199_s11 + $0x20] sm:$0xf] %v236_v8  ;;  %v238_v9 = vld [vmem:[%s1597_s10 + $0x90] sm:$0xf]  ;;  %v240_v10 = vld [vmem:[%s1597_s10 + $0xa0] sm:$0xf] }
  0x1e   : > { %v242_v11 = vld [vmem:[%s1597_s10 + $0xb0] sm:$0xf]  ;;  %239 = vst [vmem:[%s199_s11 + $0x24] sm:$0xf] %v238_v9  ;;  %241 = vst [vmem:[%s199_s11 + $0x28] sm:$0xf] %v240_v10 }
  0x1f   : > { %243 = vst [vmem:[%s199_s11 + $0x2c] sm:$0xf] %v242_v11  ;;  %v244_v12 = vld [vmem:[%s1597_s10 + $0xc0] sm:$0xf]  ;;  %v246_v13 = vld [vmem:[%s1597_s10 + $0xd0] sm:$0xf] }
  0x20   : > { %v248_v14 = vld [vmem:[%s1597_s10 + $0xe0] sm:$0xf]  ;;  %245 = vst [vmem:[%s199_s11 + $0x30] sm:$0xf] %v244_v12  ;;  %247 = vst [vmem:[%s199_s11 + $0x34] sm:$0xf] %v246_v13 }
  0x21   : > { %249 = vst [vmem:[%s199_s11 + $0x38] sm:$0xf] %v248_v14  ;;  %v250_v15 = vld [vmem:[%s1597_s10 + $0xf0] sm:$0xf] }
  0x22   : > { %251 = vst [vmem:[%s199_s11 + $0x3c] sm:$0xf] %v250_v15 }
  0x23 PF: > { %p1128_p7 = scmp.ge.s32.totalorder %s1509_s21, 1  ;;  %p338_p8 = scmp.lt.s32.totalorder %s1509_s21, 17 }
  0x25   : > { %p339_p9 = pnand %p1128_p7, %p338_p8 }
  0x26   : > { %s345_s12 = sand.u32 (!%p339_p9), 1, %s1485_s15   ;;  %p388_p10 = scmp.lt.s32.totalorder (!%p339_p9), %s1493_s17, 0 }
  0x27   : > { %342 = sbr.rel (%p339_p9) target bundleno = 549 (0x225), region = 73  ;;  %s1129_s13 = sshll.u32 (!%p339_p9), %s345_s12, 6 }
  0x28   : > { %s389_s14 = ssub.s32 (!%p339_p9), 0, %s1493_s17  ;;  %s1135_s26 = sshll.u32 (!%p339_p9), %s1497_s18, 4 }
  0x29   : > { %s1130_s24 = smin.u32 (!%p339_p9), %s1493_s17, %s389_s14  ;;  %p419_p11 = scmp.lt.s32.totalorder (!%p339_p9), %s1135_s26, 63 }
  0x2a   : > { %s391_s25 = sand.u32 (!%p339_p9), 1, %s1130_s24   ;;  %s1632_s11 = scalar_lea.vmem (!%p339_p9), [#allocation3], %s1129_s13 }
  0x2b   : > { %s392_s27 = ssub.s32 (!%p339_p9), 0, %s391_s25  ;;  %p1137_p0 = scmp.ne.s32.totalorder (!%p339_p9), %s1493_s17, 0 }
  0x2e   : > { %s1744_s27 = smov (!%p388_p10, %s392_s27), %s391_s25  ;;  %s1746_s26 = smov (!%p419_p11, %s1135_s26), 63 }
  0x2f   : > { %p1132_p12 = scmp.lt.s32.totalorder %s1744_s27, 0  ;;  %s398_s29 = sadd.s32 2, %s1744_s27  ;;  %v1511_v16 = vmov (!%p1137_p0), 0.0  }
  0x30   : > { %s1136_s30 = sshll.u32 %s1746_s26, 2  ;;  %429 = vst [vmem:[#allocation2] sm:$0xff] (!%p1137_p0), %v1511_v16  ;;  %430 = vst [vmem:[#allocation2 + $0x8] sm:$0xff] (!%p1137_p0), %v1511_v16 }
  0x31   : > { %s1748_s29 = smov (!%p1132_p12, %s398_s29), %s1744_s27  ;;  %s1625_s7 = scalar_lea.vmem %s1730_s4, %s1136_s30  ;;  %431 = vst [vmem:[#allocation2 + $0x10] sm:$0xff] (!%p1137_p0), %v1511_v16  ;;  %432 = vst [vmem:[#allocation2 + $0x18] sm:$0xff] (!%p1137_p0), %v1511_v16 }
  0x32   : > { %s1133_s15 = sshll.u32 %s1748_s29, 4  ;;  %428 = sbr.rel (%p1137_p0) target bundleno = 57 (0x39), region = 81  ;;  %433 = vst [vmem:[#allocation2 + $0x20] sm:$0xff] (!%p1137_p0), %v1511_v16  ;;  %434 = vst [vmem:[#allocation2 + $0x28] sm:$0xff] (!%p1137_p0), %v1511_v16 }
  0x33   : > { %p401_p13 = scmp.lt.s32.totalorder %s1133_s15, 31  ;;  %435 = vst [vmem:[#allocation2 + $0x30] sm:$0xff] (!%p1137_p0), %v1511_v16  ;;  %436 = vst [vmem:[#allocation2 + $0x38] sm:$0xff] (!%p1137_p0), %v1511_v16 }
  0x34   : > { %437 = vst [vmem:[#allocation2 + $0x40] sm:$0xff] (!%p1137_p0), %v1511_v16  ;;  %438 = vst [vmem:[#allocation2 + $0x48] sm:$0xff] (!%p1137_p0), %v1511_v16 }
  0x35   : > { %s1750_s15 = smov (!%p401_p13, %s1133_s15), 31  ;;  %439 = vst [vmem:[#allocation2 + $0x50] sm:$0xff] (!%p1137_p0), %v1511_v16  ;;  %440 = vst [vmem:[#allocation2 + $0x58] sm:$0xff] (!%p1137_p0), %v1511_v16 }
  0x36   : > { %s1134_s8 = sshll.u32 %s1750_s15, 2  ;;  %441 = vst [vmem:[#allocation2 + $0x60] sm:$0xff] (!%p1137_p0), %v1511_v16  ;;  %442 = vst [vmem:[#allocation2 + $0x68] sm:$0xff] (!%p1137_p0), %v1511_v16 }
  0x37   : > { %s1630_s18 = scalar_lea.vmem %s1727_s1, %s1134_s8  ;;  %443 = vst [vmem:[#allocation2 + $0x70] sm:$0xff] (!%p1137_p0), %v1511_v16  ;;  %444 = vst [vmem:[#allocation2 + $0x78] sm:$0xff] (!%p1137_p0), %v1511_v16 }
  0x39 PF: > { %v1431_v17 = vld [vmem:[%s1630_s18] sm:$0xff]   ;;  %v1432_v18 = vld [vmem:[%s1630_s18 + $0x8] sm:$0xff]   ;;  %v1433_v19 = vld [vmem:[%s1630_s18 + $0x10] sm:$0xff]   ;;  %p1154_p1 = scmp.ne.s32.totalorder %s1493_s17, 3 }
  0x3a   : > { %1278 = vmatprep.subr.bf16.mxu0 %v1431_v17  ;;  %1342 = vmatprep.subr.bf16.mxu1 %v1431_v17  ;;  %v1434_v20 = vld [vmem:[%s1630_s18 + $0x18] sm:$0xff]   ;;  %v1439_v21 = vld [vmem:[%s1632_s11] sm:$0xff]   ;;  %v1436_v24 = vld [vmem:[%s1630_s18 + $0x28] sm:$0xff]  }
  0x3b   : > { %1279 = vmatpush3.bf16.msra.mxu0 %v1431_v17  ;;  %1350 = vmatpush3.bf16.msra.mxu1 %v1431_v17  ;;  %v1440_v22 = vld [vmem:[%s1632_s11 + $0x20] sm:$0xff]   ;;  %v1437_v25 = vld [vmem:[%s1630_s18 + $0x30] sm:$0xff]   ;;  %v1438_v26 = vld [vmem:[%s1630_s18 + $0x38] sm:$0xff]  }
  0x3c   : > { %1280 = vmatprep.subr.bf16.mxu0 %v1432_v18  ;;  %1343 = vmatprep.subr.bf16.mxu1 %v1432_v18  ;;  %v1435_v23 = vld [vmem:[%s1630_s18 + $0x20] sm:$0xff]   ;;  %v1441_v27 = vld [vmem:[%s1632_s11 + $0x8] sm:$0xff]   ;;  %v1443_v29 = vld [vmem:[%s1632_s11 + $0x10] sm:$0xff]  }
  0x3d   : > { %1294 = vmatprep.mubr.bf16.mxu0 %v1439_v21  ;;  %1302 = vmatprep.mubr.bf16.mxu1 %v1440_v22  ;;  %v1442_v28 = vld [vmem:[%s1632_s11 + $0x28] sm:$0xff]   ;;  %v1444_v30 = vld [vmem:[%s1632_s11 + $0x30] sm:$0xff]   ;;  %v1445_v31 = vld [vmem:[%s1632_s11 + $0x18] sm:$0xff]  }
  0x3e   : > { %v1446_v32 = vld [vmem:[%s1632_s11 + $0x38] sm:$0xff]   ;;  %v447_v33 = vld [vmem:[#allocation2 + $0x10] sm:$0xff]  ;;  %v445_v35 = vld [vmem:[#allocation2] sm:$0xff] }
  0x3f   : > { %1281 = vmatpush3.bf16.msra.mxu0 %v1432_v18  ;;  %1351 = vmatpush3.bf16.msra.mxu1 %v1432_v18  ;;  %v455_v34 = vld [vmem:[#allocation2 + $0x50] sm:$0xff]  ;;  %v453_v36 = vld [vmem:[#allocation2 + $0x40] sm:$0xff]  ;;  %v448_v39 = vld [vmem:[#allocation2 + $0x18] sm:$0xff] }
  0x40   : > { %1282 = vmatprep.subr.bf16.mxu0 %v1433_v19  ;;  %1344 = vmatprep.subr.bf16.mxu1 %v1433_v19  ;;  %v456_v40 = vld [vmem:[#allocation2 + $0x58] sm:$0xff]  ;;  %v446_v45 = vld [vmem:[#allocation2 + $0x8] sm:$0xff]  ;;  %v451_v57 = vld [vmem:[#allocation2 + $0x30] sm:$0xff] }
  0x41   : > { %v454_v46 = vld [vmem:[#allocation2 + $0x48] sm:$0xff]  ;;  %v459_v58 = vld [vmem:[#allocation2 + $0x70] sm:$0xff]  ;;  %v449_v59 = vld [vmem:[#allocation2 + $0x20] sm:$0xff] }
  0x42   : > { %v457_v60 = vld [vmem:[#allocation2 + $0x60] sm:$0xff]  ;;  %v452_v63 = vld [vmem:[#allocation2 + $0x38] sm:$0xff]  ;;  %v450_v5 = vld [vmem:[#allocation2 + $0x28] sm:$0xff] }
  0x43   : > { %1283 = vmatpush3.bf16.msra.mxu0 %v1433_v19  ;;  %1352 = vmatpush3.bf16.msra.mxu1 %v1433_v19  ;;  %v460_v0 = vld [vmem:[#allocation2 + $0x78] sm:$0xff]  ;;  %v458_v6 = vld [vmem:[#allocation2 + $0x68] sm:$0xff]  ;;  %v1447_v17 = vld [vmem:[%s1729_s3] sm:$0xff] (!%p1154_p1)  }
  0x44   : > { %1284 = vmatprep.subr.bf16.mxu0 %v1434_v20  ;;  %1345 = vmatprep.subr.bf16.mxu1 %v1434_v20  ;;  %v1448_v18 = vld [vmem:[%s1729_s3 + $0x8] sm:$0xff] (!%p1154_p1)   ;;  %v1449_v19 = vld [vmem:[%s1729_s3 + $0x10] sm:$0xff] (!%p1154_p1)  }
  0x47   : > { %1285 = vmatpush3.bf16.msra.mxu0 %v1434_v20  ;;  %1353 = vmatpush3.bf16.msra.mxu1 %v1434_v20  ;;  %v1450_v20 = vld [vmem:[%s1729_s3 + $0x18] sm:$0xff] (!%p1154_p1)  }
  0x48   : > { %1286 = vmatprep.subr.bf16.mxu0 %v1435_v23  ;;  %1346 = vmatprep.subr.bf16.mxu1 %v1435_v23 }
  0x4b   : > { %1287 = vmatpush3.bf16.msra.mxu0 %v1435_v23  ;;  %1354 = vmatpush3.bf16.msra.mxu1 %v1435_v23  ;;  %v1667_v23 = vld [vmem:[%s1728_s2] ss:$0 sm:$0xff] (!%p1154_p1) }
  0x4c   : > { %1288 = vmatprep.subr.bf16.mxu0 %v1436_v24  ;;  %1347 = vmatprep.subr.bf16.mxu1 %v1436_v24 }
  0x4f   : > { %1289 = vmatpush3.bf16.msra.mxu0 %v1436_v24  ;;  %1355 = vmatpush3.bf16.msra.mxu1 %v1436_v24 }
  0x50   : > { %1290 = vmatprep.subr.bf16.mxu0 %v1437_v25  ;;  %1348 = vmatprep.subr.bf16.mxu1 %v1437_v25 }
  0x53   : > { %1291 = vmatpush3.bf16.msra.mxu0 %v1437_v25  ;;  %1356 = vmatpush3.bf16.msra.mxu1 %v1437_v25 }
  0x54   : > { %1292 = vmatprep.subr.bf16.mxu0 %v1438_v26  ;;  %1349 = vmatprep.subr.bf16.mxu1 %v1438_v26 }
  0x57   : > { %1293 = vmatpush3.bf16.msra.mxu0 %v1438_v26  ;;  %1357 = vmatpush3.bf16.msra.mxu1 %v1438_v26 }
  0x58   : > { %1310 = vmatprep.subr.bf16.mxu0 (!%p1154_p1), %v1447_v17  ;;  %1358 = vmatprep.subr.bf16.mxu1 (!%p1154_p1), %v1447_v17 }
  0x5a   : > { %1295 = vmatmul.mubr.bf16.vlgmr.msra.gmra.mrb[0].mxu0 %v1441_v27  ;;  %1303 = vmatmul.mubr.bf16.vlgmr.msra.gmra.mrb[0].mxu1 %v1442_v28 }
  0x5b   : > { %1298 = vmatprep.mubr.bf16.mxu0 %v1443_v29  ;;  %1306 = vmatprep.mubr.bf16.mxu1 %v1444_v30 }
  0x5c   : > { %1311 = vmatpush3.bf16.msra.mxu0 (!%p1154_p1), %v1447_v17  ;;  %1366 = vmatpush3.bf16.msra.mxu1 (!%p1154_p1), %v1447_v17 }
  0x5d   : > { %1312 = vmatprep.subr.bf16.mxu0 (!%p1154_p1), %v1448_v18  ;;  %1359 = vmatprep.subr.bf16.mxu1 (!%p1154_p1), %v1448_v18 }
  0x60   : > { %1313 = vmatpush3.bf16.msra.mxu0 (!%p1154_p1), %v1448_v18  ;;  %1367 = vmatpush3.bf16.msra.mxu1 (!%p1154_p1), %v1448_v18 }
  0x61   : > { %1314 = vmatprep.subr.bf16.mxu0 (!%p1154_p1), %v1449_v19  ;;  %1360 = vmatprep.subr.bf16.mxu1 (!%p1154_p1), %v1449_v19 }
  0x62   : > { %1299 = vmatmul.mubr.bf16.gmra.mrb[4].mxu0 %v1445_v31  ;;  %1307 = vmatmul.mubr.bf16.gmra.mrb[4].mxu1 %v1446_v32  ;;  %v1451_v32 = vld [vmem:[%s1729_s3 + $0x20] sm:$0xff] (!%p1154_p1)  }
  0x64   : > { %1315 = vmatpush3.bf16.msra.mxu0 (!%p1154_p1), %v1449_v19  ;;  %1368 = vmatpush3.bf16.msra.mxu1 (!%p1154_p1), %v1449_v19 }
  0x65   : > { %1316 = vmatprep.subr.bf16.mxu0 (!%p1154_p1), %v1450_v20  ;;  %1361 = vmatprep.subr.bf16.mxu1 (!%p1154_p1), %v1450_v20 }
  0x68   : > { %1317 = vmatpush3.bf16.msra.mxu0 (!%p1154_p1), %v1450_v20  ;;  %1369 = vmatpush3.bf16.msra.mxu1 (!%p1154_p1), %v1450_v20 }
  0x69   : > { %1318 = vmatprep.subr.bf16.mxu0 (!%p1154_p1), %v1451_v32  ;;  %1362 = vmatprep.subr.bf16.mxu1 (!%p1154_p1), %v1451_v32 }
  0x6c   : > { %1319 = vmatpush3.bf16.msra.mxu0 (!%p1154_p1), %v1451_v32  ;;  %1370 = vmatpush3.bf16.msra.mxu1 (!%p1154_p1), %v1451_v32 }
 0x12d   : > { %v1296_v37 = vpop.f32.mrb[0].mxu0  ;;  %v1304_v38 = vpop.f32.mrb[0].mxu1 }
 0x12e   : > { %v688_v41 = vadd.f32 %v1296_v37, %v447_v33  ;;  %v696_v42 = vadd.f32 %v1304_v38, %v455_v34  ;;  %v623_v43 = vpop.f32.mrb[1].mxu0  ;;  %v655_v44 = vpop.f32.mrb[1].mxu1  ;;  %v1452_v37 = vld [vmem:[%s1729_s3 + $0x28] sm:$0xff] (!%p1154_p1)   ;;  %v1453_v38 = vld [vmem:[%s1729_s3 + $0x30] sm:$0xff] (!%p1154_p1)  }
 0x12f   : > { %v686_v47 = vadd.f32 %v623_v43, %v445_v35  ;;  %v694_v48 = vadd.f32 %v655_v44, %v453_v36  ;;  %v1297_v49 = vpop.f32.mrb[2].mxu0  ;;  %v1305_v50 = vpop.f32.mrb[2].mxu1  ;;  %1320 = vmatprep.subr.bf16.mxu0 (!%p1154_p1), %v1452_v37  ;;  %1363 = vmatprep.subr.bf16.mxu1 (!%p1154_p1), %v1452_v37 }
 0x130   : > { %704 = vst [vmem:[#allocation2 + $0x10] sm:$0xff] %v688_v41  ;;  %712 = vst [vmem:[#allocation2 + $0x50] sm:$0xff] %v696_v42  ;;  %v689_v51 = vadd.f32 %v1297_v49, %v448_v39  ;;  %v697_v52 = vadd.f32 %v1305_v50, %v456_v40  ;;  %v626_v53 = vpop.f32.mrb[3].mxu0  ;;  %v658_v54 = vpop.f32.mrb[3].mxu1  ;;  %1321 = vmatpush3.bf16.msra.mxu0 (!%p1154_p1), %v1452_v37  ;;  %1371 = vmatpush3.bf16.msra.mxu1 (!%p1154_p1), %v1452_v37 }
 0x131   : > { %702 = vst [vmem:[#allocation2] sm:$0xff] %v686_v47  ;;  %710 = vst [vmem:[#allocation2 + $0x40] sm:$0xff] %v694_v48  ;;  %v687_v55 = vadd.f32 %v626_v53, %v446_v45  ;;  %v695_v56 = vadd.f32 %v658_v54, %v454_v46  ;;  %1322 = vmatprep.subr.bf16.mxu0 (!%p1154_p1), %v1453_v38  ;;  %1364 = vmatprep.subr.bf16.mxu1 (!%p1154_p1), %v1453_v38 }
 0x132   : > { %705 = vst [vmem:[#allocation2 + $0x18] sm:$0xff] %v689_v51  ;;  %713 = vst [vmem:[#allocation2 + $0x58] sm:$0xff] %v697_v52 }
 0x133   : > { %703 = vst [vmem:[#allocation2 + $0x8] sm:$0xff] %v687_v55  ;;  %711 = vst [vmem:[#allocation2 + $0x48] sm:$0xff] %v695_v56  ;;  %v1454_v55 = vld [vmem:[%s1729_s3 + $0x38] sm:$0xff] (!%p1154_p1)  }
 0x134   : > { %1323 = vmatpush3.bf16.msra.mxu0 (!%p1154_p1), %v1453_v38  ;;  %1372 = vmatpush3.bf16.msra.mxu1 (!%p1154_p1), %v1453_v38 }
 0x135   : > { %v1300_v61 = vpop.f32.mrb[4].mxu0  ;;  %v1308_v62 = vpop.f32.mrb[4].mxu1  ;;  %721 = sbr.rel (%p1154_p1) target bundleno = 549 (0x225), region = 85  ;;  %1324 = vmatprep.subr.bf16.mxu0 (!%p1154_p1), %v1454_v55  ;;  %1365 = vmatprep.subr.bf16.mxu1 (!%p1154_p1), %v1454_v55 }
 0x136   : > { %v692_v1 = vadd.f32 %v1300_v61, %v451_v57  ;;  %v700_v2 = vadd.f32 %v1308_v62, %v459_v58  ;;  %v639_v3 = vpop.f32.mrb[5].mxu0  ;;  %v671_v4 = vpop.f32.mrb[5].mxu1 }
 0x137   : > { %v690_v7 = vadd.f32 %v639_v3, %v449_v59  ;;  %v698_v8 = vadd.f32 %v671_v4, %v457_v60  ;;  %v1301_v9 = vpop.f32.mrb[6].mxu0  ;;  %v1309_v10 = vpop.f32.mrb[6].mxu1  ;;  %v724_v39 = vld [vmem:[#allocation2 + $0x10] sm:$0xff] (!%p1154_p1) }
 0x138   : > { %708 = vst [vmem:[#allocation2 + $0x30] sm:$0xff] %v692_v1  ;;  %716 = vst [vmem:[#allocation2 + $0x70] sm:$0xff] %v700_v2  ;;  %v693_v11 = vadd.f32 %v1301_v9, %v452_v63  ;;  %v701_v12 = vadd.f32 %v1309_v10, %v460_v0  ;;  %v642_v13 = vpop.f32.mrb[7].mxu0  ;;  %v674_v14 = vpop.f32.mrb[7].mxu1  ;;  %v722_v21 = vld [vmem:[#allocation2] sm:$0xff] (!%p1154_p1)  ;;  %v732_v41 = vld [vmem:[#allocation2 + $0x50] sm:$0xff] (!%p1154_p1)  ;;  %v747_v47 = vadd.f32 (!%p1154_p1), %v1667_v23, %v724_v39  ;;  %1325 = vmatpush3.bf16.msra.mxu0 (!%p1154_p1), %v1454_v55 }
 0x139   : > { %706 = vst [vmem:[#allocation2 + $0x20] sm:$0xff] %v690_v7  ;;  %714 = vst [vmem:[#allocation2 + $0x60] sm:$0xff] %v698_v8  ;;  %v691_v15 = vadd.f32 %v642_v13, %v450_v5  ;;  %v699_v16 = vadd.f32 %v674_v14, %v458_v6  ;;  %v745_v24 = vadd.f32 (!%p1154_p1), %v1667_v23, %v722_v21  ;;  %v730_v26 = vld [vmem:[#allocation2 + $0x40] sm:$0xff] (!%p1154_p1)  ;;  %v725_v40 = vld [vmem:[#allocation2 + $0x18] sm:$0xff] (!%p1154_p1)  ;;  %1373 = vmatpush3.bf16.msra.mxu1 (!%p1154_p1), %v1454_v55 }
 0x13a   : > { %709 = vst [vmem:[#allocation2 + $0x38] sm:$0xff] %v693_v11  ;;  %717 = vst [vmem:[#allocation2 + $0x78] sm:$0xff] %v701_v12  ;;  %v723_v22 = vld [vmem:[#allocation2 + $0x8] sm:$0xff] (!%p1154_p1)  ;;  %v753_v28 = vadd.f32 (!%p1154_p1), %v1667_v23, %v730_v26  ;;  %v733_v42 = vld [vmem:[#allocation2 + $0x58] sm:$0xff] (!%p1154_p1)  ;;  %v748_v48 = vadd.f32 (!%p1154_p1), %v1667_v23, %v725_v40  ;;  %v755_v49 = vadd.f32 (!%p1154_p1), %v1667_v23, %v732_v41  ;;  %v763_v56 = vmax.f32 (!%p1154_p1), %v747_v47, 0.0 }
 0x13b   : > { %707 = vst [vmem:[#allocation2 + $0x28] sm:$0xff] %v691_v15  ;;  %715 = vst [vmem:[#allocation2 + $0x68] sm:$0xff] %v699_v16  ;;  %v746_v25 = vadd.f32 (!%p1154_p1), %v1667_v23, %v723_v22  ;;  %v731_v27 = vld [vmem:[#allocation2 + $0x48] sm:$0xff] (!%p1154_p1)  ;;  %v761_v30 = vmax.f32 (!%p1154_p1), %v745_v24, 0.0  ;;  %v756_v50 = vadd.f32 (!%p1154_p1), %v1667_v23, %v733_v42 }
 0x13c   : > { %v754_v29 = vadd.f32 %v1667_v23, %v731_v27  ;;  %v769_v33 = vmax.f32 %v753_v28, 0.0  ;;  %v764_v57 = vmax.f32 %v748_v48, 0.0  ;;  %v771_v58 = vmax.f32 %v755_v49, 0.0 }
 0x13d   : > { %v762_v31 = vmax.f32 %v746_v25, 0.0  ;;  %v772_v59 = vmax.f32 %v756_v50, 0.0 }
 0x13e   : > { %v770_v34 = vmax.f32 %v754_v29, 0.0  ;;  %v778_v4 = vpack.c.bf16 %v764_v57, %v763_v56 }
 0x13f   : > { %v777_v35 = vpack.c.bf16 %v762_v31, %v761_v30  ;;  %v728_v60 = vld [vmem:[#allocation2 + $0x30] sm:$0xff]  ;;  %v782_v6 = vpack.c.bf16 %v772_v59, %v771_v58 }
 0x140   : > { %v781_v36 = vpack.c.bf16 %v770_v34, %v769_v33  ;;  %v726_v43 = vld [vmem:[#allocation2 + $0x20] sm:$0xff]  ;;  %v736_v2 = vld [vmem:[#allocation2 + $0x70] sm:$0xff]  ;;  %v751_v5 = vadd.f32 %v1667_v23, %v728_v60 }
 0x141   : > { %1326 = vmatprep.mubr.bf16.mxu0 %v777_v35  ;;  %v734_v45 = vld [vmem:[#allocation2 + $0x60] sm:$0xff]  ;;  %v749_v51 = vadd.f32 %v1667_v23, %v726_v43  ;;  %v729_v61 = vld [vmem:[#allocation2 + $0x38] sm:$0xff]  ;;  %v759_v8 = vadd.f32 %v1667_v23, %v736_v2 }
 0x142   : > { %1334 = vmatprep.mubr.bf16.mxu1 %v781_v36  ;;  %v727_v44 = vld [vmem:[#allocation2 + $0x28] sm:$0xff]  ;;  %v757_v53 = vadd.f32 %v1667_v23, %v734_v45  ;;  %v737_v3 = vld [vmem:[#allocation2 + $0x78] sm:$0xff]  ;;  %v752_v7 = vadd.f32 %v1667_v23, %v729_v61  ;;  %1327 = vmatmul.mubr.bf16.vlgmr.msra.gmra.mrb[0].mxu0 %v778_v4  ;;  %v767_v12 = vmax.f32 %v751_v5, 0.0 }
 0x143   : > { %v735_v46 = vld [vmem:[#allocation2 + $0x68] sm:$0xff]  ;;  %v750_v52 = vadd.f32 %v1667_v23, %v727_v44  ;;  %v765_v62 = vmax.f32 %v749_v51, 0.0  ;;  %v760_v9 = vadd.f32 %v1667_v23, %v737_v3  ;;  %1335 = vmatmul.mubr.bf16.vlgmr.msra.gmra.mrb[0].mxu1 %v782_v6  ;;  %v775_v14 = vmax.f32 %v759_v8, 0.0 }
 0x144   : > { %v758_v54 = vadd.f32 %v1667_v23, %v735_v46  ;;  %v773_v0 = vmax.f32 %v757_v53, 0.0  ;;  %v768_v13 = vmax.f32 %v752_v7, 0.0 }
 0x145   : > { %v766_v63 = vmax.f32 %v750_v52, 0.0  ;;  %v776_v15 = vmax.f32 %v760_v9, 0.0 }
 0x146   : > { %v774_v1 = vmax.f32 %v758_v54, 0.0  ;;  %v780_v16 = vpack.c.bf16 %v768_v13, %v767_v12 }
 0x147   : > { %v779_v10 = vpack.c.bf16 %v766_v63, %v765_v62  ;;  %v784_v17 = vpack.c.bf16 %v776_v15, %v775_v14 }
 0x148   : > { %v783_v11 = vpack.c.bf16 %v774_v1, %v773_v0 }
 0x149   : > { %1330 = vmatprep.mubr.bf16.mxu0 %v779_v10 }
 0x14a   : > { %1338 = vmatprep.mubr.bf16.mxu1 %v783_v11  ;;  %1331 = vmatmul.mubr.bf16.gmra.mrb[4].mxu0 %v780_v16 }
 0x14b   : > { %1339 = vmatmul.mubr.bf16.gmra.mrb[4].mxu1 %v784_v17 }
 0x215   : > { %v1328_v18 = vpop.f32.mrb[0].mxu0 }
 0x216   : > { %v1336_v19 = vpop.f32.mrb[0].mxu1  ;;  %v883_v20 = vpop.f32.mrb[1].mxu0 }
 0x217   : > { %v915_v21 = vpop.f32.mrb[1].mxu1  ;;  %v1329_v22 = vpop.f32.mrb[2].mxu0 }
 0x218   : > { %v1337_v23 = vpop.f32.mrb[2].mxu1  ;;  %v1207_v24 = vpack.c.bf16 %v1329_v22, %v1328_v18  ;;  %v886_v26 = vpop.f32.mrb[3].mxu0 }
 0x219   : > { %v1227_v25 = vpack.c.bf16 %v1337_v23, %v1336_v19  ;;  %v918_v27 = vpop.f32.mrb[3].mxu1  ;;  %v1202_v28 = vpack.c.bf16 %v886_v26, %v883_v20 }
 0x21a   : > { %v1222_v29 = vpack.c.bf16 %v918_v27, %v915_v21  ;;  %1239 = vst [vmem:[%s1625_s7 + $0x8] sm:$0xff] %v1207_v24  }
 0x21b   : > { %1243 = vst [vmem:[%s1625_s7 + $0x28] sm:$0xff] %v1227_v25   ;;  %1203 = vst [vmem:[%s1625_s7] sm:$0xff] %v1202_v28  }
 0x21c   : > { %1242 = vst [vmem:[%s1625_s7 + $0x20] sm:$0xff] %v1222_v29  }
 0x21d   : > { %v1332_v30 = vpop.f32.mrb[4].mxu0 }
 0x21e   : > { %v1340_v31 = vpop.f32.mrb[4].mxu1  ;;  %v899_v32 = vpop.f32.mrb[5].mxu0 }
 0x21f   : > { %v931_v33 = vpop.f32.mrb[5].mxu1  ;;  %v1333_v34 = vpop.f32.mrb[6].mxu0 }
 0x220   : > { %v1341_v35 = vpop.f32.mrb[6].mxu1  ;;  %v1217_v36 = vpack.c.bf16 %v1333_v34, %v1332_v30  ;;  %v902_v38 = vpop.f32.mrb[7].mxu0 }
 0x221   : > { %v1237_v37 = vpack.c.bf16 %v1341_v35, %v1340_v31  ;;  %v934_v39 = vpop.f32.mrb[7].mxu1  ;;  %v1212_v40 = vpack.c.bf16 %v902_v38, %v899_v32 }
 0x222   : > { %v1232_v41 = vpack.c.bf16 %v934_v39, %v931_v33  ;;  %1241 = vst [vmem:[%s1625_s7 + $0x18] sm:$0xff] %v1217_v36  }
 0x223   : > { %1245 = vst [vmem:[%s1625_s7 + $0x38] sm:$0xff] %v1237_v37   ;;  %1240 = vst [vmem:[%s1625_s7 + $0x10] sm:$0xff] %v1212_v40  }
 0x224   : > { %1244 = vst [vmem:[%s1625_s7 + $0x30] sm:$0xff] %v1232_v41  }
 0x225 PF: > { %s14_s21 = sadd.s32 1, %s1509_s21   ;;  %s1731_s15 = smov %s1489_s16 }
 0x226   : > { %p11_p2 = scmp.ge.s32.totalorder %s14_s21, 18   ;;  %s1732_s16 = smov %s1588_s28 }
 0x227   : > { %s1733_s17 = smov %s1501_s19  ;;  %s1734_s18 = smov %s1505_s20 }
 0x228   : > { %s1735_s19 = smov %s1738_s22  ;;  %s1736_s20 = smov %s1742_s23 }
 0x229   :  { %13 = sbr.rel (!%p11_p2) target bundleno = 4 (0x4), region = 123 }

</bundles_post_ra>
